<compile_context>
chip_gen: v7x
topology: tpu7x:2x2x1
jax: 0.10.0
libtpu: 0.0.40
codegen_flags: <defaults>
</compile_context>

<pallas_src>
import functools
import math

import jax
import jax.numpy as jnp
from jax import lax
from jax.experimental import pallas as pl
from jax.experimental.pallas import tpu as pltpu

NEG_INF = -1e30
B_TILE = 8        # batch rows per GRU grid step (= f32 sublane count)
LANE = 128


def _round_up(x, m):
    return (x + m - 1) // m * m


def _pad_last(x, n):
    pad = n - x.shape[-1]
    if pad == 0:
        return x
    widths = [(0, 0)] * (x.ndim - 1) + [(0, pad)]
    return jnp.pad(x, widths)


def _vmem_limit_bytes(est):
    # Request only what we need plus headroom; stay well below 64 MiB (v7x physical).
    return int(min(48 * 1024 * 1024, max(8 * 1024 * 1024, 2 * est)))


# -----------------------------------------------------------------------------
# Kernel 1: att_wrapper (Linear 4H->H + ReLU) + bidirectional GRU (time-major).
# -----------------------------------------------------------------------------
def gru_encoder_kernel(att_ref, w1_ref, b1_ref, wih_ref, bih_ref, whh_ref,
                       bhh_ref, enc_ref, xproj_scr, encf_scr, encb_scr,
                       *, seq_len, half_hidden):
    T = seq_len
    Hh = half_hidden
    Gp = whh_ref.shape[0]          # per-gate slab width (128-lane multiple)
    G3 = 3 * Gp                    # packed gate axis: [r | z | n], each [fwd|bwd|pad]

    # ---- att_wrapper + hoisted GRU input projections (one matmul each) ------
    att_bf = att_ref[...].astype(jnp.bfloat16)                        # (T*B_TILE, 4H)
    x = jnp.dot(att_bf, w1_ref[...], preferred_element_type=jnp.float32) + b1_ref[...]
    x = jnp.maximum(x, 0.0)                                           # (T*B_TILE, Hp)
    # TODO(synk): F.dropout(drop_prob) on the GRU input is stochastic; eval-mode identity.
    xproj_scr[...] = (jnp.dot(x.astype(jnp.bfloat16), wih_ref[...],
                              preferred_element_type=jnp.float32) + bih_ref[...])

    whh = whh_ref[...]                                                # (Gp, 3Gp) bf16
    bhh = bhh_ref[...]                                                # (1, 3Gp) f32

    # Within each gate slab, lanes [0:Hh) belong to the forward direction.
    lane_in_slab = lax.broadcasted_iota(jnp.int32, (B_TILE, G3), 1) % Gp
    is_fwd = lane_in_slab < Hh                                        # (B_TILE, 3Gp)

    def step(i, h):                                                   # h: (B_TILE, Gp) f32
        off_f = pl.multiple_of(i * B_TILE, B_TILE)
        off_b = pl.multiple_of((T - 1 - i) * B_TILE, B_TILE)
        row_f = xproj_scr[pl.ds(off_f, B_TILE), :]                    # fwd x-gates @ t=i
        row_b = xproj_scr[pl.ds(off_b, B_TILE), :]                    # bwd x-gates @ t=T-1-i
        gx = jnp.where(is_fwd, row_f, row_b)
        gh = jnp.dot(h.astype(jnp.bfloat16), whh,
                     preferred_element_type=jnp.float32) + bhh
        r = jax.nn.sigmoid(gx[:, 0:Gp] + gh[:, 0:Gp])
        z = jax.nn.sigmoid(gx[:, Gp:2 * Gp] + gh[:, Gp:2 * Gp])
        n = jnp.tanh(gx[:, 2 * Gp:3 * Gp] + r * gh[:, 2 * Gp:3 * Gp])
        h_new = (1.0 - z) * n + z * h                                 # pad lanes stay 0
        encf_scr[pl.ds(off_f, B_TILE), :] = h_new                     # fwd half valid @ t=i
        encb_scr[pl.ds(off_b, B_TILE), :] = h_new                     # bwd half valid @ t=T-1-i
        return h_new

    h0 = jnp.zeros((B_TILE, Gp), jnp.float32)
    lax.fori_loop(0, T, step, h0, unroll=(True if T <= 32 else 8))

    # encoder row = [h_fwd(t) | h_bwd(t) | zeros]: single lane select.
    lane = lax.broadcasted_iota(jnp.int32, (T * B_TILE, Gp), 1)
    enc_ref[...] = jnp.where(lane < Hh, encf_scr[...], encb_scr[...])


# -----------------------------------------------------------------------------
# Kernel 2: trilinear attention + masked softmax + attend + upsampler + residual.
# -----------------------------------------------------------------------------
def self_att_kernel(att_ref, enc_ref, cmc_ref, cmr_ref,
                    xw_ref, yw_ref, dw_ref, w2_ref, b2_ref, out_ref):
    att = att_ref[...].astype(jnp.float32)                            # (T, 4H)
    enc = enc_ref[...]                                                # (T, Ep) f32
    enc_bf = enc.astype(jnp.bfloat16)
    T = att.shape[0]

    # TriLinearAttention: S = (enc * dot_w) enc^T + x_factors + y_factors
    x_fac = jnp.sum(enc * xw_ref[...], axis=-1, keepdims=True)        # (T, 1)
    y_fac = lax.dot_general(yw_ref[...], enc, (((1,), (1,)), ((), ())),
                            preferred_element_type=jnp.float32)       # (1, T)
    s = lax.dot_general((enc * dw_ref[...]).astype(jnp.bfloat16), enc_bf,
                        (((1,), (1,)), ((), ())),
                        preferred_element_type=jnp.float32)           # (T, T)
    s = s + x_fac + y_fac

    # mask = c_mask (x) c_mask with zeroed diagonal; masked softmax via select.
    rows = lax.broadcasted_iota(jnp.int32, (T, T), 0)
    cols = lax.broadcasted_iota(jnp.int32, (T, T), 1)
    valid = (cmc_ref[...] > 0.0) & (cmr_ref[...] > 0.0) & (rows != cols)
    logits = jnp.where(valid, s, NEG_INF)
    logits = logits - jnp.max(logits, axis=-1, keepdims=True)
    e = jnp.exp(logits)
    p = e * pl.reciprocal(jnp.sum(e, axis=-1, keepdims=True), approx=True)

    # attend, concat [sv | enc | enc*sv] (lane-aligned 128-wide chunks), upsample
    sv = jnp.dot(p.astype(jnp.bfloat16), enc_bf,
                 preferred_element_type=jnp.float32)                  # (T, Ep)
    conc = jnp.concatenate([sv, enc, enc * sv], axis=-1)              # (T, 3*Ep)
    up = jnp.dot(conc.astype(jnp.bfloat16), w2_ref[...],
                 preferred_element_type=jnp.float32) + b2_ref[...]    # (T, 4H)

    # att_copy += relu(upsampler); final F.dropout is eval-mode identity.
    out_ref[...] = (att + jnp.maximum(up, 0.0)).astype(out_ref.dtype)


# -----------------------------------------------------------------------------
# Host-side packing / padding of parameters.
# -----------------------------------------------------------------------------
def _pack_gru(wih_f, whh_f, bih_f, bhh_f, wih_b, whh_b, bih_b, bhh_b, Hp, Gp):
    """Pack GRU params gate-major / direction-minor with 128-lane gate slabs."""
    H = wih_f.shape[1]
    Hh = wih_f.shape[2]
    G3 = 3 * Gp
    wih = jnp.zeros((Hp, G3), jnp.float32)
    bih = jnp.zeros((1, G3), jnp.float32)
    whh = jnp.zeros((Gp, G3), jnp.float32)
    bhh = jnp.zeros((1, G3), jnp.float32)
    for g in range(3):                     # gate order [r, z, n]
        c0 = g * Gp
        wih = wih.at[:H, c0:c0 + Hh].set(wih_f[g])
        wih = wih.at[:H, c0 + Hh:c0 + 2 * Hh].set(wih_b[g])
        bih = bih.at[:, c0:c0 + Hh].set(bih_f[g][0])
        bih = bih.at[:, c0 + Hh:c0 + 2 * Hh].set(bih_b[g][0])
        whh = whh.at[:Hh, c0:c0 + Hh].set(whh_f[g])
        whh = whh.at[Hh:2 * Hh, c0 + Hh:c0 + 2 * Hh].set(whh_b[g])
        bhh = bhh.at[:, c0:c0 + Hh].set(bhh_f[g][0])
        bhh = bhh.at[:, c0 + Hh:c0 + 2 * Hh].set(bhh_b[g][0])
    return wih, bih, whh, bhh


# -----------------------------------------------------------------------------
# Forward pass (wraps the two pallas_calls).
# -----------------------------------------------------------------------------
def self_att_forward(att, c_mask, params):
    B, T, H4 = att.shape
    H = H4 // 4
    assert H % 2 == 0, "bidirectional GRU with hidden_size//2 per direction needs even H"
    Hh = H // 2
    HP = _round_up(2 * Hh, LANE)      # padded hidden / encoder / GRU-input width
    G3 = 3 * HP                       # packed gate axis width

    (w1, b1,
     wih_f, whh_f, bih_f, bhh_f,
     wih_b, whh_b, bih_b, bhh_b,
     xw, yw, dw, w2, b2) = params

    # ---- pack / pad weights (host side) ------------------------------------
    w1p = _pad_last(w1, HP).astype(jnp.bfloat16)                       # (4H, HP)
    b1p = _pad_last(b1, HP)                                            # (1, HP)
    wihp, bihp, whhp, bhhp = _pack_gru(wih_f, whh_f, bih_f, bhh_f,
                                       wih_b, whh_b, bih_b, bhh_b, HP, HP)
    wihp = wihp.astype(jnp.bfloat16)
    whhp = whhp.astype(jnp.bfloat16)
    xwp = _pad_last(xw, HP)
    ywp = _pad_last(yw, HP)
    dwp = _pad_last(dw, HP)
    w2cat = jnp.zeros((3 * HP, H4), jnp.float32)
    for c in range(3):                                                 # [sv | enc | enc*sv]
        w2cat = w2cat.at[c * HP:c * HP + H, :].set(w2[c])
    w2cat = w2cat.astype(jnp.bfloat16)

    # ---- kernel 1: GRU encoder (batch-blocked, time-major slabs) ------------
    B_pad = _round_up(B, B_TILE)
    nb = B_pad // B_TILE
    att_p = jnp.pad(att.astype(jnp.float32), ((0, B_pad - B), (0, 0), (0, 0)))
    att_tm = (att_p.reshape(nb, B_TILE, T, H4)
              .transpose(0, 2, 1, 3)
              .reshape(nb, T * B_TILE, H4))                            # row = t*B_TILE + b

    est1 = (2 * (T * B_TILE * H4 * 4 + T * B_TILE * HP * 4)
            + T * B_TILE * (G3 + 2 * HP) * 4
            + (H4 * HP + 2 * HP * G3) * 2 + (HP + 2 * G3) * 4
            + T * B_TILE * (HP + G3 + H4) * 4)

    full2 = lambda shape: pl.BlockSpec(shape, lambda i: (0, 0))
    enc_tm = pl.pallas_call(
        functools.partial(gru_encoder_kernel, seq_len=T, half_hidden=Hh),
        out_shape=jax.ShapeDtypeStruct((nb, T * B_TILE, HP), jnp.float32),
        grid_spec=pltpu.PrefetchScalarGridSpec(
            num_scalar_prefetch=0,
            grid=(nb,),
            in_specs=[
                pl.BlockSpec((None, T * B_TILE, H4), lambda i: (i, 0, 0)),  # att (time-major)
                full2((H4, HP)), full2((1, HP)),                            # att_wrapper
                full2((HP, G3)), full2((1, G3)),                            # GRU input proj
                full2((HP, G3)), full2((1, G3)),                            # GRU hidden proj
            ],
            out_specs=pl.BlockSpec((None, T * B_TILE, HP), lambda i: (i, 0, 0)),
            scratch_shapes=[
                pltpu.VMEM((T * B_TILE, G3), jnp.float32),     # hoisted x-gate projections
                pltpu.VMEM((T * B_TILE, HP), jnp.float32),     # rows written on fwd index
                pltpu.VMEM((T * B_TILE, HP), jnp.float32),     # rows written on bwd index
            ],
        ),
        compiler_params=pltpu.CompilerParams(
            dimension_semantics=("parallel",),
            vmem_limit_bytes=_vmem_limit_bytes(est1),
        ),
    )(att_tm, w1p, b1p, wihp, bihp, whhp, bhhp)

    enc = (enc_tm.reshape(nb, T, B_TILE, HP)
           .transpose(0, 2, 1, 3)
           .reshape(B_pad, T, HP)[:B])                                 # (B, T, HP), f32

    # ---- kernel 2: trilinear self-attention + upsampler + residual ----------
    cm = c_mask.astype(jnp.float32)
    cm_col = cm[:, :, None]                                            # (B, T, 1)
    cm_row = cm[:, None, :]                                            # (B, 1, T)

    est2 = (2 * (2 * T * H4 * 4 + T * HP * 4 + 8 * T * 4)
            + 4 * T * T * 4 + 3 * HP * H4 * 2 + 4 * T * HP * 4)

    full2b = lambda shape: pl.BlockSpec(shape, lambda b: (0, 0))
    out = pl.pallas_call(
        self_att_kernel,
        out_shape=jax.ShapeDtypeStruct((B, T, H4), att.dtype),
        grid_spec=pltpu.PrefetchScalarGridSpec(
            num_scalar_prefetch=0,
            grid=(B,),
            in_specs=[
                pl.BlockSpec((None, T, H4), lambda b: (b, 0, 0)),      # att (residual)
                pl.BlockSpec((None, T, HP), lambda b: (b, 0, 0)),      # encoder
                pl.BlockSpec((None, T, 1), lambda b: (b, 0, 0)),       # c_mask column
                pl.BlockSpec((None, 1, T), lambda b: (b, 0, 0)),       # c_mask row
                full2b((1, HP)), full2b((1, HP)), full2b((1, HP)),     # trilinear x / y / dot
                full2b((3 * HP, H4)), full2b((1, H4)),                 # fused upsampler
            ],
            out_specs=pl.BlockSpec((None, T, H4), lambda b: (b, 0, 0)),
        ),
        compiler_params=pltpu.CompilerParams(
            dimension_semantics=("parallel",),
            vmem_limit_bytes=_vmem_limit_bytes(est2),
        ),
    )(att, enc, cm_col, cm_row, xwp, ywp, dwp, w2cat, b2)
    return out


# -----------------------------------------------------------------------------
# Parameter init mirroring the PyTorch module's defaults.
# -----------------------------------------------------------------------------
def init_params(key, hidden_size):
    H = hidden_size
    H4, Hh = 4 * H, H // 2
    keys = jax.random.split(key, 9)

    def u(k, shape, bound):
        return jax.random.uniform(k, shape, jnp.float32, minval=-bound, maxval=bound)

    lb1 = 1.0 / math.sqrt(H4)
    w1 = u(keys[0], (H4, H), lb1)            # Linear(4H -> H), stored transposed (x @ W)
    b1 = u(keys[1], (1, H), lb1)

    gb = 1.0 / math.sqrt(Hh)

    def gru_dir_params(k):
        ks = jax.random.split(k, 4)
        wih = u(ks[0], (3, H, Hh), gb)       # gate order [r, z, n], x @ W
        whh = u(ks[1], (3, Hh, Hh), gb)      # h @ W
        bih = u(ks[2], (3, 1, Hh), gb)
        bhh = u(ks[3], (3, 1, Hh), gb)
        return wih, whh, bih, bhh

    wih_f, whh_f, bih_f, bhh_f = gru_dir_params(keys[2])
    wih_b, whh_b, bih_b, bhh_b = gru_dir_params(keys[3])

    tstd = math.sqrt(6.0 / (H * 3 + 1))      # TriLinearAttention.reset_parameters
    xw = u(keys[4], (1, H), tstd)
    yw = u(keys[5], (1, H), tstd)
    dw = u(keys[6], (1, H), tstd)

    lb2 = 1.0 / math.sqrt(3 * H)
    w2 = u(keys[7], (3, H, H4), lb2)         # Linear(3H -> 4H), split per concat chunk
    b2 = u(keys[8], (1, H4), lb2)

    return (w1, b1,
            wih_f, whh_f, bih_f, bhh_f,
            wih_b, whh_b, bih_b, bhh_b,
            xw, yw, dw,
            w2, b2)


if __name__ == "__main__":
    B, T, H = 2, 8, 32                       # att feature dim = 4 * H = 128
    key = jax.random.PRNGKey(0)
    k_att, k_params = jax.random.split(key, 2)

    att = jax.random.normal(k_att, (B, T, 4 * H), jnp.float32)
    lengths = jnp.array([T, 5], dtype=jnp.int32)
    c_mask = (jnp.arange(T)[None, :] < lengths[:, None]).astype(jnp.float32)

    params = init_params(k_params, H)

    out = self_att_forward(att, c_mask, params)
    jax.block_until_ready(out)
    assert out.shape == (B, T, 4 * H)
    assert bool(jnp.isfinite(out).all())
    print("KERNEL_OK")
</pallas_src>

<mosaic_0001>
module attributes {stable_mosaic.version = 11 : i64} {
  func.func @gru_encoder_kernel(%arg0: i32, %arg1: memref<1x64x128xf32, #tpu.memory_space<vmem>>, %arg2: memref<128x128xbf16, #tpu.memory_space<vmem>>, %arg3: memref<1x128xf32, #tpu.memory_space<vmem>>, %arg4: memref<128x384xbf16, #tpu.memory_space<vmem>>, %arg5: memref<1x384xf32, #tpu.memory_space<vmem>>, %arg6: memref<128x384xbf16, #tpu.memory_space<vmem>>, %arg7: memref<1x384xf32, #tpu.memory_space<vmem>>, %arg8: memref<1x64x128xf32, #tpu.memory_space<vmem>>, %arg9: memref<64x384xf32, #tpu.memory_space<vmem>>, %arg10: memref<64x128xf32, #tpu.memory_space<vmem>>, %arg11: memref<64x128xf32, #tpu.memory_space<vmem>>) attributes {dimension_semantics = [#tpu.dimension_semantics<parallel>], iteration_bounds = array<i64: 1>, scalar_prefetch = 0 : i64, scratch_operands = 3 : i64, tpu.core_type = #tpu.core_type<tc>, window_params = [{transform_indices = @transform_0, window_bounds = array<i64: 1, 64, 128>}, {pipeline_mode = #tpu.pipeline_mode<synchronous>, transform_indices = @transform_1, window_bounds = array<i64: 128, 128>}, {pipeline_mode = #tpu.pipeline_mode<synchronous>, transform_indices = @transform_2, window_bounds = array<i64: 1, 128>}, {pipeline_mode = #tpu.pipeline_mode<synchronous>, transform_indices = @transform_3, window_bounds = array<i64: 128, 384>}, {pipeline_mode = #tpu.pipeline_mode<synchronous>, transform_indices = @transform_4, window_bounds = array<i64: 1, 384>}, {pipeline_mode = #tpu.pipeline_mode<synchronous>, transform_indices = @transform_5, window_bounds = array<i64: 128, 384>}, {pipeline_mode = #tpu.pipeline_mode<synchronous>, transform_indices = @transform_6, window_bounds = array<i64: 1, 384>}, {transform_indices = @transform_7, window_bounds = array<i64: 1, 64, 128>}]} {
    %c0 = arith.constant 0 : index
    %c0_0 = arith.constant 0 : index
    %c0_1 = arith.constant 0 : index
    %0 = vector.load %arg1[%c0, %c0_0, %c0_1] : memref<1x64x128xf32, #tpu.memory_space<vmem>>, vector<1x64x128xf32>
    %1 = vector.shape_cast %0 : vector<1x64x128xf32> to vector<64x128xf32>
    %2 = arith.truncf %1 : vector<64x128xf32> to vector<64x128xbf16>
    %c0_2 = arith.constant 0 : index
    %c0_3 = arith.constant 0 : index
    %3 = vector.load %arg2[%c0_2, %c0_3] : memref<128x128xbf16, #tpu.memory_space<vmem>>, vector<128x128xbf16>
    %cst = arith.constant dense<0.000000e+00> : vector<64x128xf32>
    %4 = tpu.matmul %2, %3, %cst {dimension_numbers = #tpu.dot_dimension_numbers<[1], [0], [0], [1], [0, 0, 1, 1], [], []>} : vector<64x128xbf16>, vector<128x128xbf16>, vector<64x128xf32> -> vector<64x128xf32>
    %c0_4 = arith.constant 0 : index
    %c0_5 = arith.constant 0 : index
    %5 = vector.load %arg3[%c0_4, %c0_5] : memref<1x128xf32, #tpu.memory_space<vmem>>, vector<1x128xf32>
    %6 = vector.broadcast %5 : vector<1x128xf32> to vector<64x128xf32>
    %7 = arith.addf %4, %6 : vector<64x128xf32>
    %cst_6 = arith.constant 0.000000e+00 : f32
    %8 = vector.broadcast %cst_6 : f32 to vector<64x128xf32>
    %9 = arith.maximumf %7, %8 : vector<64x128xf32>
    %10 = arith.truncf %9 : vector<64x128xf32> to vector<64x128xbf16>
    %c0_7 = arith.constant 0 : index
    %c0_8 = arith.constant 0 : index
    %11 = vector.load %arg4[%c0_7, %c0_8] : memref<128x384xbf16, #tpu.memory_space<vmem>>, vector<128x384xbf16>
    %cst_9 = arith.constant dense<0.000000e+00> : vector<64x384xf32>
    %12 = tpu.matmul %10, %11, %cst_9 {dimension_numbers = #tpu.dot_dimension_numbers<[1], [0], [0], [1], [0, 0, 1, 1], [], []>} : vector<64x128xbf16>, vector<128x384xbf16>, vector<64x384xf32> -> vector<64x384xf32>
    %c0_10 = arith.constant 0 : index
    %c0_11 = arith.constant 0 : index
    %13 = vector.load %arg5[%c0_10, %c0_11] : memref<1x384xf32, #tpu.memory_space<vmem>>, vector<1x384xf32>
    %14 = vector.broadcast %13 : vector<1x384xf32> to vector<64x384xf32>
    %15 = arith.addf %12, %14 : vector<64x384xf32>
    %c0_12 = arith.constant 0 : index
    %c0_13 = arith.constant 0 : index
    %16 = vector.load %arg9[%c0_12, %c0_13] : memref<64x384xf32, #tpu.memory_space<vmem>>, vector<64x384xf32>
    tpu.vector_store %arg9[%c0_12, %c0_13], %15 {strides = array<i32>} : memref<64x384xf32, #tpu.memory_space<vmem>>, vector<64x384xf32>,
    %c0_14 = arith.constant 0 : index
    %c0_15 = arith.constant 0 : index
    %17 = vector.load %arg6[%c0_14, %c0_15] : memref<128x384xbf16, #tpu.memory_space<vmem>>, vector<128x384xbf16>
    %c0_16 = arith.constant 0 : index
    %c0_17 = arith.constant 0 : index
    %18 = vector.load %arg7[%c0_16, %c0_17] : memref<1x384xf32, #tpu.memory_space<vmem>>, vector<1x384xf32>
    %19 = tpu.iota {dimensions = array<i32: 1>} : vector<8x384xi32>
    %c128_i32 = arith.constant 128 : i32
    %c0_i32 = arith.constant 0 : i32
    %20 = arith.cmpi eq, %c128_i32, %c0_i32 : i32
    %c1_i32 = arith.constant 1 : i32
    %21 = arith.select %20, %c1_i32, %c128_i32 : i32
    %22 = vector.broadcast %21 : i32 to vector<8x384xi32>
    %23 = arith.remsi %19, %22 : vector<8x384xi32>
    %c0_i32_18 = arith.constant 0 : i32
    %24 = vector.broadcast %c0_i32_18 : i32 to vector<8x384xi32>
    %25 = arith.cmpi ne, %23, %24 : vector<8x384xi32>
    %c0_i32_19 = arith.constant 0 : i32
    %26 = vector.broadcast %c0_i32_19 : i32 to vector<8x384xi32>
    %27 = arith.cmpi slt, %23, %26 : vector<8x384xi32>
    %c0_i32_20 = arith.constant 0 : i32
    %28 = arith.cmpi slt, %21, %c0_i32_20 : i32
    %29 = vector.broadcast %28 : i1 to vector<8x384xi1>
    %30 = vector.broadcast %29 : vector<8x384xi1> to vector<8x384xi1>
    %31 = arith.xori %27, %30 : vector<8x384xi1>
    %32 = arith.andi %31, %25 : vector<8x384xi1>
    %33 = vector.broadcast %21 : i32 to vector<8x384xi32>
    %34 = arith.addi %23, %33 : vector<8x384xi32>
    %35 = arith.select %32, %34, %23 : vector<8x384xi1>, vector<8x384xi32>
    %c16_i32 = arith.constant 16 : i32
    %36 = vector.broadcast %c16_i32 : i32 to vector<8x384xi32>
    %37 = arith.cmpi slt, %35, %36 : vector<8x384xi32>
    %cst_21 = arith.constant 0.000000e+00 : f32
    %38 = vector.broadcast %cst_21 : f32 to vector<8x128xf32>
    %c0_i32_22 = arith.constant 0 : i32
    %c8_i32 = arith.constant 8 : i32
    %39 = arith.muli %c0_i32_22, %c8_i32 : i32
    %40 = tpu.assume_multiple %39, 8 : i32
    %c7_i32 = arith.constant 7 : i32
    %41 = arith.subi %c7_i32, %c0_i32_22 : i32
    %c8_i32_23 = arith.constant 8 : i32
    %42 = arith.muli %41, %c8_i32_23 : i32
    %43 = tpu.assume_multiple %42, 8 : i32
    %44 = arith.index_cast %40 : i32 to index
    %c0_24 = arith.constant 0 : index
    %45 = vector.load %arg9[%44, %c0_24] : memref<64x384xf32, #tpu.memory_space<vmem>>, vector<8x384xf32>
    %46 = arith.index_cast %43 : i32 to index
    %c0_25 = arith.constant 0 : index
    %47 = vector.load %arg9[%46, %c0_25] : memref<64x384xf32, #tpu.memory_space<vmem>>, vector<8x384xf32>
    %48 = arith.select %37, %45, %47 : vector<8x384xi1>, vector<8x384xf32>
    %49 = arith.truncf %38 : vector<8x128xf32> to vector<8x128xbf16>
    %cst_26 = arith.constant dense<0.000000e+00> : vector<8x384xf32>
    %50 = tpu.matmul %49, %17, %cst_26 {dimension_numbers = #tpu.dot_dimension_numbers<[1], [0], [0], [1], [0, 0, 1, 1], [], []>} : vector<8x128xbf16>, vector<128x384xbf16>, vector<8x384xf32> -> vector<8x384xf32>
    %51 = vector.broadcast %18 : vector<1x384xf32> to vector<8x384xf32>
    %52 = arith.addf %50, %51 : vector<8x384xf32>
    %53 = vector.extract_strided_slice %48 {offsets = [0, 0], sizes = [8, 128], strides = [1, 1]} : vector<8x384xf32> to vector<8x128xf32>
    %54 = vector.extract_strided_slice %52 {offsets = [0, 0], sizes = [8, 128], strides = [1, 1]} : vector<8x384xf32> to vector<8x128xf32>
    %55 = arith.addf %53, %54 : vector<8x128xf32>
    %56 = arith.negf %55 : vector<8x128xf32>
    %57 = math.exp %56 : vector<8x128xf32>
    %cst_27 = arith.constant 1.000000e+00 : f32
    %58 = vector.broadcast %cst_27 : f32 to vector<8x128xf32>
    %59 = arith.addf %58, %57 : vector<8x128xf32>
    %60 = arith.divf %58, %59 : vector<8x128xf32>
    %61 = vector.extract_strided_slice %48 {offsets = [0, 128], sizes = [8, 128], strides = [1, 1]} : vector<8x384xf32> to vector<8x128xf32>
    %62 = vector.extract_strided_slice %52 {offsets = [0, 128], sizes = [8, 128], strides = [1, 1]} : vector<8x384xf32> to vector<8x128xf32>
    %63 = arith.addf %61, %62 : vector<8x128xf32>
    %64 = arith.negf %63 : vector<8x128xf32>
    %65 = math.exp %64 : vector<8x128xf32>
    %cst_28 = arith.constant 1.000000e+00 : f32
    %66 = vector.broadcast %cst_28 : f32 to vector<8x128xf32>
    %67 = arith.addf %66, %65 : vector<8x128xf32>
    %68 = arith.divf %66, %67 : vector<8x128xf32>
    %69 = vector.extract_strided_slice %48 {offsets = [0, 256], sizes = [8, 128], strides = [1, 1]} : vector<8x384xf32> to vector<8x128xf32>
    %70 = vector.extract_strided_slice %52 {offsets = [0, 256], sizes = [8, 128], strides = [1, 1]} : vector<8x384xf32> to vector<8x128xf32>
    %71 = arith.mulf %60, %70 : vector<8x128xf32>
    %72 = arith.addf %69, %71 : vector<8x128xf32>
    %73 = math.tanh %72 : vector<8x128xf32>
    %cst_29 = arith.constant 1.000000e+00 : f32
    %74 = vector.broadcast %cst_29 : f32 to vector<8x128xf32>
    %75 = arith.subf %74, %68 : vector<8x128xf32>
    %76 = arith.mulf %75, %73 : vector<8x128xf32>
    %77 = arith.mulf %68, %38 : vector<8x128xf32>
    %78 = arith.addf %76, %77 : vector<8x128xf32>
    %79 = arith.index_cast %40 : i32 to index
    %c0_30 = arith.constant 0 : index
    %80 = vector.load %arg10[%79, %c0_30] : memref<64x128xf32, #tpu.memory_space<vmem>>, vector<8x128xf32>
    tpu.vector_store %arg10[%79, %c0_30], %78 {strides = array<i32>} : memref<64x128xf32, #tpu.memory_space<vmem>>, vector<8x128xf32>,
    %81 = arith.index_cast %43 : i32 to index
    %c0_31 = arith.constant 0 : index
    %82 = vector.load %arg11[%81, %c0_31] : memref<64x128xf32, #tpu.memory_space<vmem>>, vector<8x128xf32>
    tpu.vector_store %arg11[%81, %c0_31], %78 {strides = array<i32>} : memref<64x128xf32, #tpu.memory_space<vmem>>, vector<8x128xf32>,
    %c1_i32_32 = arith.constant 1 : i32
    %c8_i32_33 = arith.constant 8 : i32
    %83 = arith.muli %c1_i32_32, %c8_i32_33 : i32
    %84 = tpu.assume_multiple %83, 8 : i32
    %c7_i32_34 = arith.constant 7 : i32
    %85 = arith.subi %c7_i32_34, %c1_i32_32 : i32
    %c8_i32_35 = arith.constant 8 : i32
    %86 = arith.muli %85, %c8_i32_35 : i32
    %87 = tpu.assume_multiple %86, 8 : i32
    %88 = arith.index_cast %84 : i32 to index
    %c0_36 = arith.constant 0 : index
    %89 = vector.load %arg9[%88, %c0_36] : memref<64x384xf32, #tpu.memory_space<vmem>>, vector<8x384xf32>
    %90 = arith.index_cast %87 : i32 to index
    %c0_37 = arith.constant 0 : index
    %91 = vector.load %arg9[%90, %c0_37] : memref<64x384xf32, #tpu.memory_space<vmem>>, vector<8x384xf32>
    %92 = arith.select %37, %89, %91 : vector<8x384xi1>, vector<8x384xf32>
    %93 = arith.truncf %78 : vector<8x128xf32> to vector<8x128xbf16>
    %cst_38 = arith.constant dense<0.000000e+00> : vector<8x384xf32>
    %94 = tpu.matmul %93, %17, %cst_38 {dimension_numbers = #tpu.dot_dimension_numbers<[1], [0], [0], [1], [0, 0, 1, 1], [], []>} : vector<8x128xbf16>, vector<128x384xbf16>, vector<8x384xf32> -> vector<8x384xf32>
    %95 = vector.broadcast %18 : vector<1x384xf32> to vector<8x384xf32>
    %96 = arith.addf %94, %95 : vector<8x384xf32>
    %97 = vector.extract_strided_slice %92 {offsets = [0, 0], sizes = [8, 128], strides = [1, 1]} : vector<8x384xf32> to vector<8x128xf32>
    %98 = vector.extract_strided_slice %96 {offsets = [0, 0], sizes = [8, 128], strides = [1, 1]} : vector<8x384xf32> to vector<8x128xf32>
    %99 = arith.addf %97, %98 : vector<8x128xf32>
    %100 = arith.negf %99 : vector<8x128xf32>
    %101 = math.exp %100 : vector<8x128xf32>
    %cst_39 = arith.constant 1.000000e+00 : f32
    %102 = vector.broadcast %cst_39 : f32 to vector<8x128xf32>
    %103 = arith.addf %102, %101 : vector<8x128xf32>
    %104 = arith.divf %102, %103 : vector<8x128xf32>
    %105 = vector.extract_strided_slice %92 {offsets = [0, 128], sizes = [8, 128], strides = [1, 1]} : vector<8x384xf32> to vector<8x128xf32>
    %106 = vector.extract_strided_slice %96 {offsets = [0, 128], sizes = [8, 128], strides = [1, 1]} : vector<8x384xf32> to vector<8x128xf32>
    %107 = arith.addf %105, %106 : vector<8x128xf32>
    %108 = arith.negf %107 : vector<8x128xf32>
    %109 = math.exp %108 : vector<8x128xf32>
    %cst_40 = arith.constant 1.000000e+00 : f32
    %110 = vector.broadcast %cst_40 : f32 to vector<8x128xf32>
    %111 = arith.addf %110, %109 : vector<8x128xf32>
    %112 = arith.divf %110, %111 : vector<8x128xf32>
    %113 = vector.extract_strided_slice %92 {offsets = [0, 256], sizes = [8, 128], strides = [1, 1]} : vector<8x384xf32> to vector<8x128xf32>
    %114 = vector.extract_strided_slice %96 {offsets = [0, 256], sizes = [8, 128], strides = [1, 1]} : vector<8x384xf32> to vector<8x128xf32>
    %115 = arith.mulf %104, %114 : vector<8x128xf32>
    %116 = arith.addf %113, %115 : vector<8x128xf32>
    %117 = math.tanh %116 : vector<8x128xf32>
    %cst_41 = arith.constant 1.000000e+00 : f32
    %118 = vector.broadcast %cst_41 : f32 to vector<8x128xf32>
    %119 = arith.subf %118, %112 : vector<8x128xf32>
    %120 = arith.mulf %119, %117 : vector<8x128xf32>
    %121 = arith.mulf %112, %78 : vector<8x128xf32>
    %122 = arith.addf %120, %121 : vector<8x128xf32>
    %123 = arith.index_cast %84 : i32 to index
    %c0_42 = arith.constant 0 : index
    %124 = vector.load %arg10[%123, %c0_42] : memref<64x128xf32, #tpu.memory_space<vmem>>, vector<8x128xf32>
    tpu.vector_store %arg10[%123, %c0_42], %122 {strides = array<i32>} : memref<64x128xf32, #tpu.memory_space<vmem>>, vector<8x128xf32>,
    %125 = arith.index_cast %87 : i32 to index
    %c0_43 = arith.constant 0 : index
    %126 = vector.load %arg11[%125, %c0_43] : memref<64x128xf32, #tpu.memory_space<vmem>>, vector<8x128xf32>
    tpu.vector_store %arg11[%125, %c0_43], %122 {strides = array<i32>} : memref<64x128xf32, #tpu.memory_space<vmem>>, vector<8x128xf32>,
    %c2_i32 = arith.constant 2 : i32
    %c8_i32_44 = arith.constant 8 : i32
    %127 = arith.muli %c2_i32, %c8_i32_44 : i32
    %128 = tpu.assume_multiple %127, 8 : i32
    %c7_i32_45 = arith.constant 7 : i32
    %129 = arith.subi %c7_i32_45, %c2_i32 : i32
    %c8_i32_46 = arith.constant 8 : i32
    %130 = arith.muli %129, %c8_i32_46 : i32
    %131 = tpu.assume_multiple %130, 8 : i32
    %132 = arith.index_cast %128 : i32 to index
    %c0_47 = arith.constant 0 : index
    %133 = vector.load %arg9[%132, %c0_47] : memref<64x384xf32, #tpu.memory_space<vmem>>, vector<8x384xf32>
    %134 = arith.index_cast %131 : i32 to index
    %c0_48 = arith.constant 0 : index
    %135 = vector.load %arg9[%134, %c0_48] : memref<64x384xf32, #tpu.memory_space<vmem>>, vector<8x384xf32>
    %136 = arith.select %37, %133, %135 : vector<8x384xi1>, vector<8x384xf32>
    %137 = arith.truncf %122 : vector<8x128xf32> to vector<8x128xbf16>
    %cst_49 = arith.constant dense<0.000000e+00> : vector<8x384xf32>
    %138 = tpu.matmul %137, %17, %cst_49 {dimension_numbers = #tpu.dot_dimension_numbers<[1], [0], [0], [1], [0, 0, 1, 1], [], []>} : vector<8x128xbf16>, vector<128x384xbf16>, vector<8x384xf32> -> vector<8x384xf32>
    %139 = vector.broadcast %18 : vector<1x384xf32> to vector<8x384xf32>
    %140 = arith.addf %138, %139 : vector<8x384xf32>
    %141 = vector.extract_strided_slice %136 {offsets = [0, 0], sizes = [8, 128], strides = [1, 1]} : vector<8x384xf32> to vector<8x128xf32>
    %142 = vector.extract_strided_slice %140 {offsets = [0, 0], sizes = [8, 128], strides = [1, 1]} : vector<8x384xf32> to vector<8x128xf32>
    %143 = arith.addf %141, %142 : vector<8x128xf32>
    %144 = arith.negf %143 : vector<8x128xf32>
    %145 = math.exp %144 : vector<8x128xf32>
    %cst_50 = arith.constant 1.000000e+00 : f32
    %146 = vector.broadcast %cst_50 : f32 to vector<8x128xf32>
    %147 = arith.addf %146, %145 : vector<8x128xf32>
    %148 = arith.divf %146, %147 : vector<8x128xf32>
    %149 = vector.extract_strided_slice %136 {offsets = [0, 128], sizes = [8, 128], strides = [1, 1]} : vector<8x384xf32> to vector<8x128xf32>
    %150 = vector.extract_strided_slice %140 {offsets = [0, 128], sizes = [8, 128], strides = [1, 1]} : vector<8x384xf32> to vector<8x128xf32>
    %151 = arith.addf %149, %150 : vector<8x128xf32>
    %152 = arith.negf %151 : vector<8x128xf32>
    %153 = math.exp %152 : vector<8x128xf32>
    %cst_51 = arith.constant 1.000000e+00 : f32
    %154 = vector.broadcast %cst_51 : f32 to vector<8x128xf32>
    %155 = arith.addf %154, %153 : vector<8x128xf32>
    %156 = arith.divf %154, %155 : vector<8x128xf32>
    %157 = vector.extract_strided_slice %136 {offsets = [0, 256], sizes = [8, 128], strides = [1, 1]} : vector<8x384xf32> to vector<8x128xf32>
    %158 = vector.extract_strided_slice %140 {offsets = [0, 256], sizes = [8, 128], strides = [1, 1]} : vector<8x384xf32> to vector<8x128xf32>
    %159 = arith.mulf %148, %158 : vector<8x128xf32>
    %160 = arith.addf %157, %159 : vector<8x128xf32>
    %161 = math.tanh %160 : vector<8x128xf32>
    %cst_52 = arith.constant 1.000000e+00 : f32
    %162 = vector.broadcast %cst_52 : f32 to vector<8x128xf32>
    %163 = arith.subf %162, %156 : vector<8x128xf32>
    %164 = arith.mulf %163, %161 : vector<8x128xf32>
    %165 = arith.mulf %156, %122 : vector<8x128xf32>
    %166 = arith.addf %164, %165 : vector<8x128xf32>
    %167 = arith.index_cast %128 : i32 to index
    %c0_53 = arith.constant 0 : index
    %168 = vector.load %arg10[%167, %c0_53] : memref<64x128xf32, #tpu.memory_space<vmem>>, vector<8x128xf32>
    tpu.vector_store %arg10[%167, %c0_53], %166 {strides = array<i32>} : memref<64x128xf32, #tpu.memory_space<vmem>>, vector<8x128xf32>,
    %169 = arith.index_cast %131 : i32 to index
    %c0_54 = arith.constant 0 : index
    %170 = vector.load %arg11[%169, %c0_54] : memref<64x128xf32, #tpu.memory_space<vmem>>, vector<8x128xf32>
    tpu.vector_store %arg11[%169, %c0_54], %166 {strides = array<i32>} : memref<64x128xf32, #tpu.memory_space<vmem>>, vector<8x128xf32>,
    %c3_i32 = arith.constant 3 : i32
    %c8_i32_55 = arith.constant 8 : i32
    %171 = arith.muli %c3_i32, %c8_i32_55 : i32
    %172 = tpu.assume_multiple %171, 8 : i32
    %c7_i32_56 = arith.constant 7 : i32
    %173 = arith.subi %c7_i32_56, %c3_i32 : i32
    %c8_i32_57 = arith.constant 8 : i32
    %174 = arith.muli %173, %c8_i32_57 : i32
    %175 = tpu.assume_multiple %174, 8 : i32
    %176 = arith.index_cast %172 : i32 to index
    %c0_58 = arith.constant 0 : index
    %177 = vector.load %arg9[%176, %c0_58] : memref<64x384xf32, #tpu.memory_space<vmem>>, vector<8x384xf32>
    %178 = arith.index_cast %175 : i32 to index
    %c0_59 = arith.constant 0 : index
    %179 = vector.load %arg9[%178, %c0_59] : memref<64x384xf32, #tpu.memory_space<vmem>>, vector<8x384xf32>
    %180 = arith.select %37, %177, %179 : vector<8x384xi1>, vector<8x384xf32>
    %181 = arith.truncf %166 : vector<8x128xf32> to vector<8x128xbf16>
    %cst_60 = arith.constant dense<0.000000e+00> : vector<8x384xf32>
    %182 = tpu.matmul %181, %17, %cst_60 {dimension_numbers = #tpu.dot_dimension_numbers<[1], [0], [0], [1], [0, 0, 1, 1], [], []>} : vector<8x128xbf16>, vector<128x384xbf16>, vector<8x384xf32> -> vector<8x384xf32>
    %183 = vector.broadcast %18 : vector<1x384xf32> to vector<8x384xf32>
    %184 = arith.addf %182, %183 : vector<8x384xf32>
    %185 = vector.extract_strided_slice %180 {offsets = [0, 0], sizes = [8, 128], strides = [1, 1]} : vector<8x384xf32> to vector<8x128xf32>
    %186 = vector.extract_strided_slice %184 {offsets = [0, 0], sizes = [8, 128], strides = [1, 1]} : vector<8x384xf32> to vector<8x128xf32>
    %187 = arith.addf %185, %186 : vector<8x128xf32>
    %188 = arith.negf %187 : vector<8x128xf32>
    %189 = math.exp %188 : vector<8x128xf32>
    %cst_61 = arith.constant 1.000000e+00 : f32
    %190 = vector.broadcast %cst_61 : f32 to vector<8x128xf32>
    %191 = arith.addf %190, %189 : vector<8x128xf32>
    %192 = arith.divf %190, %191 : vector<8x128xf32>
    %193 = vector.extract_strided_slice %180 {offsets = [0, 128], sizes = [8, 128], strides = [1, 1]} : vector<8x384xf32> to vector<8x128xf32>
    %194 = vector.extract_strided_slice %184 {offsets = [0, 128], sizes = [8, 128], strides = [1, 1]} : vector<8x384xf32> to vector<8x128xf32>
    %195 = arith.addf %193, %194 : vector<8x128xf32>
    %196 = arith.negf %195 : vector<8x128xf32>
    %197 = math.exp %196 : vector<8x128xf32>
    %cst_62 = arith.constant 1.000000e+00 : f32
    %198 = vector.broadcast %cst_62 : f32 to vector<8x128xf32>
    %199 = arith.addf %198, %197 : vector<8x128xf32>
    %200 = arith.divf %198, %199 : vector<8x128xf32>
    %201 = vector.extract_strided_slice %180 {offsets = [0, 256], sizes = [8, 128], strides = [1, 1]} : vector<8x384xf32> to vector<8x128xf32>
    %202 = vector.extract_strided_slice %184 {offsets = [0, 256], sizes = [8, 128], strides = [1, 1]} : vector<8x384xf32> to vector<8x128xf32>
    %203 = arith.mulf %192, %202 : vector<8x128xf32>
    %204 = arith.addf %201, %203 : vector<8x128xf32>
    %205 = math.tanh %204 : vector<8x128xf32>
    %cst_63 = arith.constant 1.000000e+00 : f32
    %206 = vector.broadcast %cst_63 : f32 to vector<8x128xf32>
    %207 = arith.subf %206, %200 : vector<8x128xf32>
    %208 = arith.mulf %207, %205 : vector<8x128xf32>
    %209 = arith.mulf %200, %166 : vector<8x128xf32>
    %210 = arith.addf %208, %209 : vector<8x128xf32>
    %211 = arith.index_cast %172 : i32 to index
    %c0_64 = arith.constant 0 : index
    %212 = vector.load %arg10[%211, %c0_64] : memref<64x128xf32, #tpu.memory_space<vmem>>, vector<8x128xf32>
    tpu.vector_store %arg10[%211, %c0_64], %210 {strides = array<i32>} : memref<64x128xf32, #tpu.memory_space<vmem>>, vector<8x128xf32>,
    %213 = arith.index_cast %175 : i32 to index
    %c0_65 = arith.constant 0 : index
    %214 = vector.load %arg11[%213, %c0_65] : memref<64x128xf32, #tpu.memory_space<vmem>>, vector<8x128xf32>
    tpu.vector_store %arg11[%213, %c0_65], %210 {strides = array<i32>} : memref<64x128xf32, #tpu.memory_space<vmem>>, vector<8x128xf32>,
    %c4_i32 = arith.constant 4 : i32
    %c8_i32_66 = arith.constant 8 : i32
    %215 = arith.muli %c4_i32, %c8_i32_66 : i32
    %216 = tpu.assume_multiple %215, 8 : i32
    %c7_i32_67 = arith.constant 7 : i32
    %217 = arith.subi %c7_i32_67, %c4_i32 : i32
    %c8_i32_68 = arith.constant 8 : i32
    %218 = arith.muli %217, %c8_i32_68 : i32
    %219 = tpu.assume_multiple %218, 8 : i32
    %220 = arith.index_cast %216 : i32 to index
    %c0_69 = arith.constant 0 : index
    %221 = vector.load %arg9[%220, %c0_69] : memref<64x384xf32, #tpu.memory_space<vmem>>, vector<8x384xf32>
    %222 = arith.index_cast %219 : i32 to index
    %c0_70 = arith.constant 0 : index
    %223 = vector.load %arg9[%222, %c0_70] : memref<64x384xf32, #tpu.memory_space<vmem>>, vector<8x384xf32>
    %224 = arith.select %37, %221, %223 : vector<8x384xi1>, vector<8x384xf32>
    %225 = arith.truncf %210 : vector<8x128xf32> to vector<8x128xbf16>
    %cst_71 = arith.constant dense<0.000000e+00> : vector<8x384xf32>
    %226 = tpu.matmul %225, %17, %cst_71 {dimension_numbers = #tpu.dot_dimension_numbers<[1], [0], [0], [1], [0, 0, 1, 1], [], []>} : vector<8x128xbf16>, vector<128x384xbf16>, vector<8x384xf32> -> vector<8x384xf32>
    %227 = vector.broadcast %18 : vector<1x384xf32> to vector<8x384xf32>
    %228 = arith.addf %226, %227 : vector<8x384xf32>
    %229 = vector.extract_strided_slice %224 {offsets = [0, 0], sizes = [8, 128], strides = [1, 1]} : vector<8x384xf32> to vector<8x128xf32>
    %230 = vector.extract_strided_slice %228 {offsets = [0, 0], sizes = [8, 128], strides = [1, 1]} : vector<8x384xf32> to vector<8x128xf32>
    %231 = arith.addf %229, %230 : vector<8x128xf32>
    %232 = arith.negf %231 : vector<8x128xf32>
    %233 = math.exp %232 : vector<8x128xf32>
    %cst_72 = arith.constant 1.000000e+00 : f32
    %234 = vector.broadcast %cst_72 : f32 to vector<8x128xf32>
    %235 = arith.addf %234, %233 : vector<8x128xf32>
    %236 = arith.divf %234, %235 : vector<8x128xf32>
    %237 = vector.extract_strided_slice %224 {offsets = [0, 128], sizes = [8, 128], strides = [1, 1]} : vector<8x384xf32> to vector<8x128xf32>
    %238 = vector.extract_strided_slice %228 {offsets = [0, 128], sizes = [8, 128], strides = [1, 1]} : vector<8x384xf32> to vector<8x128xf32>
    %239 = arith.addf %237, %238 : vector<8x128xf32>
    %240 = arith.negf %239 : vector<8x128xf32>
    %241 = math.exp %240 : vector<8x128xf32>
    %cst_73 = arith.constant 1.000000e+00 : f32
    %242 = vector.broadcast %cst_73 : f32 to vector<8x128xf32>
    %243 = arith.addf %242, %241 : vector<8x128xf32>
    %244 = arith.divf %242, %243 : vector<8x128xf32>
    %245 = vector.extract_strided_slice %224 {offsets = [0, 256], sizes = [8, 128], strides = [1, 1]} : vector<8x384xf32> to vector<8x128xf32>
    %246 = vector.extract_strided_slice %228 {offsets = [0, 256], sizes = [8, 128], strides = [1, 1]} : vector<8x384xf32> to vector<8x128xf32>
    %247 = arith.mulf %236, %246 : vector<8x128xf32>
    %248 = arith.addf %245, %247 : vector<8x128xf32>
    %249 = math.tanh %248 : vector<8x128xf32>
    %cst_74 = arith.constant 1.000000e+00 : f32
    %250 = vector.broadcast %cst_74 : f32 to vector<8x128xf32>
    %251 = arith.subf %250, %244 : vector<8x128xf32>
    %252 = arith.mulf %251, %249 : vector<8x128xf32>
    %253 = arith.mulf %244, %210 : vector<8x128xf32>
    %254 = arith.addf %252, %253 : vector<8x128xf32>
    %255 = arith.index_cast %216 : i32 to index
    %c0_75 = arith.constant 0 : index
    %256 = vector.load %arg10[%255, %c0_75] : memref<64x128xf32, #tpu.memory_space<vmem>>, vector<8x128xf32>
    tpu.vector_store %arg10[%255, %c0_75], %254 {strides = array<i32>} : memref<64x128xf32, #tpu.memory_space<vmem>>, vector<8x128xf32>,
    %257 = arith.index_cast %219 : i32 to index
    %c0_76 = arith.constant 0 : index
    %258 = vector.load %arg11[%257, %c0_76] : memref<64x128xf32, #tpu.memory_space<vmem>>, vector<8x128xf32>
    tpu.vector_store %arg11[%257, %c0_76], %254 {strides = array<i32>} : memref<64x128xf32, #tpu.memory_space<vmem>>, vector<8x128xf32>,
    %c5_i32 = arith.constant 5 : i32
    %c8_i32_77 = arith.constant 8 : i32
    %259 = arith.muli %c5_i32, %c8_i32_77 : i32
    %260 = tpu.assume_multiple %259, 8 : i32
    %c7_i32_78 = arith.constant 7 : i32
    %261 = arith.subi %c7_i32_78, %c5_i32 : i32
    %c8_i32_79 = arith.constant 8 : i32
    %262 = arith.muli %261, %c8_i32_79 : i32
    %263 = tpu.assume_multiple %262, 8 : i32
    %264 = arith.index_cast %260 : i32 to index
    %c0_80 = arith.constant 0 : index
    %265 = vector.load %arg9[%264, %c0_80] : memref<64x384xf32, #tpu.memory_space<vmem>>, vector<8x384xf32>
    %266 = arith.index_cast %263 : i32 to index
    %c0_81 = arith.constant 0 : index
    %267 = vector.load %arg9[%266, %c0_81] : memref<64x384xf32, #tpu.memory_space<vmem>>, vector<8x384xf32>
    %268 = arith.select %37, %265, %267 : vector<8x384xi1>, vector<8x384xf32>
    %269 = arith.truncf %254 : vector<8x128xf32> to vector<8x128xbf16>
    %cst_82 = arith.constant dense<0.000000e+00> : vector<8x384xf32>
    %270 = tpu.matmul %269, %17, %cst_82 {dimension_numbers = #tpu.dot_dimension_numbers<[1], [0], [0], [1], [0, 0, 1, 1], [], []>} : vector<8x128xbf16>, vector<128x384xbf16>, vector<8x384xf32> -> vector<8x384xf32>
    %271 = vector.broadcast %18 : vector<1x384xf32> to vector<8x384xf32>
    %272 = arith.addf %270, %271 : vector<8x384xf32>
    %273 = vector.extract_strided_slice %268 {offsets = [0, 0], sizes = [8, 128], strides = [1, 1]} : vector<8x384xf32> to vector<8x128xf32>
    %274 = vector.extract_strided_slice %272 {offsets = [0, 0], sizes = [8, 128], strides = [1, 1]} : vector<8x384xf32> to vector<8x128xf32>
    %275 = arith.addf %273, %274 : vector<8x128xf32>
    %276 = arith.negf %275 : vector<8x128xf32>
    %277 = math.exp %276 : vector<8x128xf32>
    %cst_83 = arith.constant 1.000000e+00 : f32
    %278 = vector.broadcast %cst_83 : f32 to vector<8x128xf32>
    %279 = arith.addf %278, %277 : vector<8x128xf32>
    %280 = arith.divf %278, %279 : vector<8x128xf32>
    %281 = vector.extract_strided_slice %268 {offsets = [0, 128], sizes = [8, 128], strides = [1, 1]} : vector<8x384xf32> to vector<8x128xf32>
    %282 = vector.extract_strided_slice %272 {offsets = [0, 128], sizes = [8, 128], strides = [1, 1]} : vector<8x384xf32> to vector<8x128xf32>
    %283 = arith.addf %281, %282 : vector<8x128xf32>
    %284 = arith.negf %283 : vector<8x128xf32>
    %285 = math.exp %284 : vector<8x128xf32>
    %cst_84 = arith.constant 1.000000e+00 : f32
    %286 = vector.broadcast %cst_84 : f32 to vector<8x128xf32>
    %287 = arith.addf %286, %285 : vector<8x128xf32>
    %288 = arith.divf %286, %287 : vector<8x128xf32>
    %289 = vector.extract_strided_slice %268 {offsets = [0, 256], sizes = [8, 128], strides = [1, 1]} : vector<8x384xf32> to vector<8x128xf32>
    %290 = vector.extract_strided_slice %272 {offsets = [0, 256], sizes = [8, 128], strides = [1, 1]} : vector<8x384xf32> to vector<8x128xf32>
    %291 = arith.mulf %280, %290 : vector<8x128xf32>
    %292 = arith.addf %289, %291 : vector<8x128xf32>
    %293 = math.tanh %292 : vector<8x128xf32>
    %cst_85 = arith.constant 1.000000e+00 : f32
    %294 = vector.broadcast %cst_85 : f32 to vector<8x128xf32>
    %295 = arith.subf %294, %288 : vector<8x128xf32>
    %296 = arith.mulf %295, %293 : vector<8x128xf32>
    %297 = arith.mulf %288, %254 : vector<8x128xf32>
    %298 = arith.addf %296, %297 : vector<8x128xf32>
    %299 = arith.index_cast %260 : i32 to index
    %c0_86 = arith.constant 0 : index
    %300 = vector.load %arg10[%299, %c0_86] : memref<64x128xf32, #tpu.memory_space<vmem>>, vector<8x128xf32>
    tpu.vector_store %arg10[%299, %c0_86], %298 {strides = array<i32>} : memref<64x128xf32, #tpu.memory_space<vmem>>, vector<8x128xf32>,
    %301 = arith.index_cast %263 : i32 to index
    %c0_87 = arith.constant 0 : index
    %302 = vector.load %arg11[%301, %c0_87] : memref<64x128xf32, #tpu.memory_space<vmem>>, vector<8x128xf32>
    tpu.vector_store %arg11[%301, %c0_87], %298 {strides = array<i32>} : memref<64x128xf32, #tpu.memory_space<vmem>>, vector<8x128xf32>,
    %c6_i32 = arith.constant 6 : i32
    %c8_i32_88 = arith.constant 8 : i32
    %303 = arith.muli %c6_i32, %c8_i32_88 : i32
    %304 = tpu.assume_multiple %303, 8 : i32
    %c7_i32_89 = arith.constant 7 : i32
    %305 = arith.subi %c7_i32_89, %c6_i32 : i32
    %c8_i32_90 = arith.constant 8 : i32
    %306 = arith.muli %305, %c8_i32_90 : i32
    %307 = tpu.assume_multiple %306, 8 : i32
    %308 = arith.index_cast %304 : i32 to index
    %c0_91 = arith.constant 0 : index
    %309 = vector.load %arg9[%308, %c0_91] : memref<64x384xf32, #tpu.memory_space<vmem>>, vector<8x384xf32>
    %310 = arith.index_cast %307 : i32 to index
    %c0_92 = arith.constant 0 : index
    %311 = vector.load %arg9[%310, %c0_92] : memref<64x384xf32, #tpu.memory_space<vmem>>, vector<8x384xf32>
    %312 = arith.select %37, %309, %311 : vector<8x384xi1>, vector<8x384xf32>
    %313 = arith.truncf %298 : vector<8x128xf32> to vector<8x128xbf16>
    %cst_93 = arith.constant dense<0.000000e+00> : vector<8x384xf32>
    %314 = tpu.matmul %313, %17, %cst_93 {dimension_numbers = #tpu.dot_dimension_numbers<[1], [0], [0], [1], [0, 0, 1, 1], [], []>} : vector<8x128xbf16>, vector<128x384xbf16>, vector<8x384xf32> -> vector<8x384xf32>
    %315 = vector.broadcast %18 : vector<1x384xf32> to vector<8x384xf32>
    %316 = arith.addf %314, %315 : vector<8x384xf32>
    %317 = vector.extract_strided_slice %312 {offsets = [0, 0], sizes = [8, 128], strides = [1, 1]} : vector<8x384xf32> to vector<8x128xf32>
    %318 = vector.extract_strided_slice %316 {offsets = [0, 0], sizes = [8, 128], strides = [1, 1]} : vector<8x384xf32> to vector<8x128xf32>
    %319 = arith.addf %317, %318 : vector<8x128xf32>
    %320 = arith.negf %319 : vector<8x128xf32>
    %321 = math.exp %320 : vector<8x128xf32>
    %cst_94 = arith.constant 1.000000e+00 : f32
    %322 = vector.broadcast %cst_94 : f32 to vector<8x128xf32>
    %323 = arith.addf %322, %321 : vector<8x128xf32>
    %324 = arith.divf %322, %323 : vector<8x128xf32>
    %325 = vector.extract_strided_slice %312 {offsets = [0, 128], sizes = [8, 128], strides = [1, 1]} : vector<8x384xf32> to vector<8x128xf32>
    %326 = vector.extract_strided_slice %316 {offsets = [0, 128], sizes = [8, 128], strides = [1, 1]} : vector<8x384xf32> to vector<8x128xf32>
    %327 = arith.addf %325, %326 : vector<8x128xf32>
    %328 = arith.negf %327 : vector<8x128xf32>
    %329 = math.exp %328 : vector<8x128xf32>
    %cst_95 = arith.constant 1.000000e+00 : f32
    %330 = vector.broadcast %cst_95 : f32 to vector<8x128xf32>
    %331 = arith.addf %330, %329 : vector<8x128xf32>
    %332 = arith.divf %330, %331 : vector<8x128xf32>
    %333 = vector.extract_strided_slice %312 {offsets = [0, 256], sizes = [8, 128], strides = [1, 1]} : vector<8x384xf32> to vector<8x128xf32>
    %334 = vector.extract_strided_slice %316 {offsets = [0, 256], sizes = [8, 128], strides = [1, 1]} : vector<8x384xf32> to vector<8x128xf32>
    %335 = arith.mulf %324, %334 : vector<8x128xf32>
    %336 = arith.addf %333, %335 : vector<8x128xf32>
    %337 = math.tanh %336 : vector<8x128xf32>
    %cst_96 = arith.constant 1.000000e+00 : f32
    %338 = vector.broadcast %cst_96 : f32 to vector<8x128xf32>
    %339 = arith.subf %338, %332 : vector<8x128xf32>
    %340 = arith.mulf %339, %337 : vector<8x128xf32>
    %341 = arith.mulf %332, %298 : vector<8x128xf32>
    %342 = arith.addf %340, %341 : vector<8x128xf32>
    %343 = arith.index_cast %304 : i32 to index
    %c0_97 = arith.constant 0 : index
    %344 = vector.load %arg10[%343, %c0_97] : memref<64x128xf32, #tpu.memory_space<vmem>>, vector<8x128xf32>
    tpu.vector_store %arg10[%343, %c0_97], %342 {strides = array<i32>} : memref<64x128xf32, #tpu.memory_space<vmem>>, vector<8x128xf32>,
    %345 = arith.index_cast %307 : i32 to index
    %c0_98 = arith.constant 0 : index
    %346 = vector.load %arg11[%345, %c0_98] : memref<64x128xf32, #tpu.memory_space<vmem>>, vector<8x128xf32>
    tpu.vector_store %arg11[%345, %c0_98], %342 {strides = array<i32>} : memref<64x128xf32, #tpu.memory_space<vmem>>, vector<8x128xf32>,
    %c7_i32_99 = arith.constant 7 : i32
    %c8_i32_100 = arith.constant 8 : i32
    %347 = arith.muli %c7_i32_99, %c8_i32_100 : i32
    %348 = tpu.assume_multiple %347, 8 : i32
    %c7_i32_101 = arith.constant 7 : i32
    %349 = arith.subi %c7_i32_101, %c7_i32_99 : i32
    %c8_i32_102 = arith.constant 8 : i32
    %350 = arith.muli %349, %c8_i32_102 : i32
    %351 = tpu.assume_multiple %350, 8 : i32
    %352 = arith.index_cast %348 : i32 to index
    %c0_103 = arith.constant 0 : index
    %353 = vector.load %arg9[%352, %c0_103] : memref<64x384xf32, #tpu.memory_space<vmem>>, vector<8x384xf32>
    %354 = arith.index_cast %351 : i32 to index
    %c0_104 = arith.constant 0 : index
    %355 = vector.load %arg9[%354, %c0_104] : memref<64x384xf32, #tpu.memory_space<vmem>>, vector<8x384xf32>
    %356 = arith.select %37, %353, %355 : vector<8x384xi1>, vector<8x384xf32>
    %357 = arith.truncf %342 : vector<8x128xf32> to vector<8x128xbf16>
    %cst_105 = arith.constant dense<0.000000e+00> : vector<8x384xf32>
    %358 = tpu.matmul %357, %17, %cst_105 {dimension_numbers = #tpu.dot_dimension_numbers<[1], [0], [0], [1], [0, 0, 1, 1], [], []>} : vector<8x128xbf16>, vector<128x384xbf16>, vector<8x384xf32> -> vector<8x384xf32>
    %359 = vector.broadcast %18 : vector<1x384xf32> to vector<8x384xf32>
    %360 = arith.addf %358, %359 : vector<8x384xf32>
    %361 = vector.extract_strided_slice %356 {offsets = [0, 0], sizes = [8, 128], strides = [1, 1]} : vector<8x384xf32> to vector<8x128xf32>
    %362 = vector.extract_strided_slice %360 {offsets = [0, 0], sizes = [8, 128], strides = [1, 1]} : vector<8x384xf32> to vector<8x128xf32>
    %363 = arith.addf %361, %362 : vector<8x128xf32>
    %364 = arith.negf %363 : vector<8x128xf32>
    %365 = math.exp %364 : vector<8x128xf32>
    %cst_106 = arith.constant 1.000000e+00 : f32
    %366 = vector.broadcast %cst_106 : f32 to vector<8x128xf32>
    %367 = arith.addf %366, %365 : vector<8x128xf32>
    %368 = arith.divf %366, %367 : vector<8x128xf32>
    %369 = vector.extract_strided_slice %356 {offsets = [0, 128], sizes = [8, 128], strides = [1, 1]} : vector<8x384xf32> to vector<8x128xf32>
    %370 = vector.extract_strided_slice %360 {offsets = [0, 128], sizes = [8, 128], strides = [1, 1]} : vector<8x384xf32> to vector<8x128xf32>
    %371 = arith.addf %369, %370 : vector<8x128xf32>
    %372 = arith.negf %371 : vector<8x128xf32>
    %373 = math.exp %372 : vector<8x128xf32>
    %cst_107 = arith.constant 1.000000e+00 : f32
    %374 = vector.broadcast %cst_107 : f32 to vector<8x128xf32>
    %375 = arith.addf %374, %373 : vector<8x128xf32>
    %376 = arith.divf %374, %375 : vector<8x128xf32>
    %377 = vector.extract_strided_slice %356 {offsets = [0, 256], sizes = [8, 128], strides = [1, 1]} : vector<8x384xf32> to vector<8x128xf32>
    %378 = vector.extract_strided_slice %360 {offsets = [0, 256], sizes = [8, 128], strides = [1, 1]} : vector<8x384xf32> to vector<8x128xf32>
    %379 = arith.mulf %368, %378 : vector<8x128xf32>
    %380 = arith.addf %377, %379 : vector<8x128xf32>
    %381 = math.tanh %380 : vector<8x128xf32>
    %cst_108 = arith.constant 1.000000e+00 : f32
    %382 = vector.broadcast %cst_108 : f32 to vector<8x128xf32>
    %383 = arith.subf %382, %376 : vector<8x128xf32>
    %384 = arith.mulf %383, %381 : vector<8x128xf32>
    %385 = arith.mulf %376, %342 : vector<8x128xf32>
    %386 = arith.addf %384, %385 : vector<8x128xf32>
    %387 = arith.index_cast %348 : i32 to index
    %c0_109 = arith.constant 0 : index
    %388 = vector.load %arg10[%387, %c0_109] : memref<64x128xf32, #tpu.memory_space<vmem>>, vector<8x128xf32>
    tpu.vector_store %arg10[%387, %c0_109], %386 {strides = array<i32>} : memref<64x128xf32, #tpu.memory_space<vmem>>, vector<8x128xf32>,
    %389 = arith.index_cast %351 : i32 to index
    %c0_110 = arith.constant 0 : index
    %390 = vector.load %arg11[%389, %c0_110] : memref<64x128xf32, #tpu.memory_space<vmem>>, vector<8x128xf32>
    tpu.vector_store %arg11[%389, %c0_110], %386 {strides = array<i32>} : memref<64x128xf32, #tpu.memory_space<vmem>>, vector<8x128xf32>,
    %c8_i32_111 = arith.constant 8 : i32
    %391 = tpu.iota {dimensions = array<i32: 1>} : vector<64x128xi32>
    %c16_i32_112 = arith.constant 16 : i32
    %392 = vector.broadcast %c16_i32_112 : i32 to vector<64x128xi32>
    %393 = arith.cmpi slt, %391, %392 : vector<64x128xi32>
    %c0_113 = arith.constant 0 : index
    %c0_114 = arith.constant 0 : index
    %394 = vector.load %arg10[%c0_113, %c0_114] : memref<64x128xf32, #tpu.memory_space<vmem>>, vector<64x128xf32>
    %c0_115 = arith.constant 0 : index
    %c0_116 = arith.constant 0 : index
    %395 = vector.load %arg11[%c0_115, %c0_116] : memref<64x128xf32, #tpu.memory_space<vmem>>, vector<64x128xf32>
    %396 = arith.select %393, %394, %395 : vector<64x128xi1>, vector<64x128xf32>
    %c0_117 = arith.constant 0 : index
    %c0_118 = arith.constant 0 : index
    %c0_119 = arith.constant 0 : index
    %397 = vector.load %arg8[%c0_117, %c0_118, %c0_119] : memref<1x64x128xf32, #tpu.memory_space<vmem>>, vector<1x64x128xf32>
    %398 = vector.shape_cast %397 : vector<1x64x128xf32> to vector<64x128xf32>
    %399 = vector.shape_cast %396 : vector<64x128xf32> to vector<1x64x128xf32>
    tpu.vector_store %arg8[%c0_117, %c0_118, %c0_119], %399 {strides = array<i32>} : memref<1x64x128xf32, #tpu.memory_space<vmem>>, vector<1x64x128xf32>,
    return
  }
  func.func @transform_0(%arg0: i32) -> (i32, i32, i32) {
    %c0_i32 = arith.constant 0 : i32
    %c0_i32_0 = arith.constant 0 : i32
    %c0_i32_1 = arith.constant 0 : i32
    return %arg0, %c0_i32, %c0_i32_0 : i32, i32, i32
  }
  func.func @transform_1(%arg0: i32) -> (i32, i32) {
    %c0_i32 = arith.constant 0 : i32
    %c0_i32_0 = arith.constant 0 : i32
    %c0_i32_1 = arith.constant 0 : i32
    return %c0_i32, %c0_i32_0 : i32, i32
  }
  func.func @transform_2(%arg0: i32) -> (i32, i32) {
    %c0_i32 = arith.constant 0 : i32
    %c0_i32_0 = arith.constant 0 : i32
    %c0_i32_1 = arith.constant 0 : i32
    return %c0_i32, %c0_i32_0 : i32, i32
  }
  func.func @transform_3(%arg0: i32) -> (i32, i32) {
    %c0_i32 = arith.constant 0 : i32
    %c0_i32_0 = arith.constant 0 : i32
    %c0_i32_1 = arith.constant 0 : i32
    return %c0_i32, %c0_i32_0 : i32, i32
  }
  func.func @transform_4(%arg0: i32) -> (i32, i32) {
    %c0_i32 = arith.constant 0 : i32
    %c0_i32_0 = arith.constant 0 : i32
    %c0_i32_1 = arith.constant 0 : i32
    return %c0_i32, %c0_i32_0 : i32, i32
  }
  func.func @transform_5(%arg0: i32) -> (i32, i32) {
    %c0_i32 = arith.constant 0 : i32
    %c0_i32_0 = arith.constant 0 : i32
    %c0_i32_1 = arith.constant 0 : i32
    return %c0_i32, %c0_i32_0 : i32, i32
  }
  func.func @transform_6(%arg0: i32) -> (i32, i32) {
    %c0_i32 = arith.constant 0 : i32
    %c0_i32_0 = arith.constant 0 : i32
    %c0_i32_1 = arith.constant 0 : i32
    return %c0_i32, %c0_i32_0 : i32, i32
  }
  func.func @transform_7(%arg0: i32) -> (i32, i32, i32) {
    %c0_i32 = arith.constant 0 : i32
    %c0_i32_0 = arith.constant 0 : i32
    %c0_i32_1 = arith.constant 0 : i32
    return %arg0, %c0_i32, %c0_i32_0 : i32, i32, i32
  }
}

</mosaic_0001>

<bundles_post_ra>
// kernel: tpu_custom_call.1
= control target key start
LH: loop header
LB: loop body
LE: loop exit
PB: predicated region body
PF: predicated region fallthrough
CT: control target
= control target key end

     0   :  { %12 = vsyncpa [#allocation6], 0  ;;  %s3314_s0 = inlined_call_operand.hbm [shape: f32[1,64,128], index: 0, kind: input, shape index: {}]   ;;  %s3315_s1 = inlined_call_operand.hbm [shape: bf16[128,128], index: 1, kind: input, shape index: {}]   ;;  %s3316_s2 = inlined_call_operand.vmem [shape: f32[1,128], index: 2, kind: input, shape index: {}]   ;;  %s3317_s3 = inlined_call_operand.hbm [shape: bf16[128,384], index: 3, kind: input, shape index: {}]   ;;  %s3318_s4 = inlined_call_operand.vmem [shape: f32[1,384], index: 4, kind: input, shape index: {}]   ;;  %s3319_s5 = inlined_call_operand.hbm [shape: bf16[128,384], index: 5, kind: input, shape index: {}]   ;;  %s3320_s6 = inlined_call_operand.vmem [shape: f32[1,384], index: 6, kind: input, shape index: {}]   ;;  %s3321_s7 = inlined_call_operand.hbm [shape: f32[1,64,128], index: 7, kind: output, shape index: {}]  }
   0x1   :  { %13 = vsyncpa [#allocation9], 0 }
   0x2   :  { %14 = vsyncpa [#allocation12], 0 }
   0x3   :  { %15 = vsyncpa [#allocation7], 0  ;;  %s2495_s24 = smov [#allocation8]   ;;  %s2377_s28 = scalar_lea.hbm %s3315_s1, 1024 }
   0x4   :  { %s33_s25 = sshll.u32 %s2495_s24, 4  ;;  %p2378_p0 = scmp.ne.s32.totalorder %s3315_s1, %s2377_s28  ;;  %s34_s25 = int_to_ptr.vmem [resolvable:$true] %s33_s25 }
   0x5   :  { %p2381_p1 = scmp.lt.u32.totalorder %s2377_s28, %s3315_s1 }
   0x7   :  { %p2383_p2 = pnand %p2381_p1, %p2378_p0 }
   0x9   :  { %2386 = shalt.err (!%p2383_p2)
}
   0xa   :  { %s2387_s10 = scalar_lea.vmem %s34_s25, 1024  ;;  %p2392_p4 = scmp.lt.s32.totalorder %s34_s25, %s34_s25 }
   0xb   :  { %p2388_p3 = scmp.ne.s32.totalorder %s34_s25, %s2387_s10  ;;  %p2393_p5 = scmp.lt.s32.totalorder %s2387_s10, %s2387_s10 }
   0xd   :  { %p2394_p6 = por %p2393_p5, %p2392_p4 }
   0xf   :  { %p2395_p7 = pnand %p2394_p6, %p2388_p3 }
  0x11   :  { %2398 = shalt.err (!%p2395_p7)
}
  0x12   :  { %s2496_s11 = smov 64   ;;  %s2497_s12 = smov 4  }
  0x13   :  { %39 = dma.hbm_to_vmem [thread:$0]  %s3315_s1, 1024, %s34_s25, [#allocation9], %s2496_s11, %s2496_s11, %s2497_s12  }
  0x14   :  { %s2498_s15 = smov [#allocation5]   ;;  %s2399_s19 = scalar_lea.hbm %s3314_s0, 1024 }
  0x15   :  { %s21_s16 = sshll.u32 %s2498_s15, 4  ;;  %p2400_p8 = scmp.ne.s32.totalorder %s3314_s0, %s2399_s19  ;;  %s22_s16 = int_to_ptr.vmem [resolvable:$true] %s21_s16 }
  0x16   :  { %p2403_p9 = scmp.lt.u32.totalorder %s2399_s19, %s3314_s0 }
  0x18   :  { %p2405_p10 = pnand %p2403_p9, %p2400_p8 }
  0x1a   :  { %2408 = shalt.err (!%p2405_p10)
}
  0x1b   :  { %s2409_s24 = scalar_lea.vmem %s22_s16, 1024  ;;  %p2414_p12 = scmp.lt.s32.totalorder %s22_s16, %s22_s16 }
  0x1c   :  { %p2410_p11 = scmp.ne.s32.totalorder %s22_s16, %s2409_s24  ;;  %p2415_p13 = scmp.lt.s32.totalorder %s2409_s24, %s2409_s24 }
  0x1e   :  { %p2416_p0 = por %p2415_p13, %p2414_p12 }
  0x20   :  { %p2417_p1 = pnand %p2416_p0, %p2410_p11 }
  0x22   :  { %2420 = shalt.err (!%p2417_p1)
}
  0x23   :  { %s2499_s1 = smov 128   ;;  %s2500_s25 = smov 8  }
  0x24   :  { %27 = dma.hbm_to_vmem [thread:$0]  %s3314_s0, 1024, %s22_s16, [#allocation6], %s2499_s1, %s2499_s1, %s2500_s25  }
  0x25   :  { %s2501_s28 = smov [#allocation10]   ;;  %s2421_s9 = scalar_lea.hbm %s3317_s3, 3072 }
  0x26   :  { %s47_s29 = sshll.u32 %s2501_s28, 4  ;;  %p2422_p2 = scmp.ne.s32.totalorder %s3317_s3, %s2421_s9  ;;  %s48_s29 = int_to_ptr.vmem [resolvable:$true] %s47_s29 }
  0x27   :  { %p2425_p3 = scmp.lt.u32.totalorder %s2421_s9, %s3317_s3 }
  0x29   :  { %p2427_p4 = pnand %p2425_p3, %p2422_p2 }
  0x2b   :  { %2430 = shalt.err (!%p2427_p4)
}
  0x2c   :  { %s2431_s14 = scalar_lea.vmem %s48_s29, 3072  ;;  %p2436_p6 = scmp.lt.s32.totalorder %s48_s29, %s48_s29 }
  0x2d   :  { %p2432_p5 = scmp.ne.s32.totalorder %s48_s29, %s2431_s14  ;;  %p2437_p7 = scmp.lt.s32.totalorder %s2431_s14, %s2431_s14 }
  0x2f   :  { %p2438_p8 = por %p2437_p7, %p2436_p6 }
  0x31   :  { %p2439_p9 = pnand %p2438_p8, %p2432_p5 }
  0x33   :  { %2442 = shalt.err (!%p2439_p9)
}
  0x34   :  { %s2502_s0 = smov 192   ;;  %s2503_s15 = smov 12  }
  0x35   :  { %53 = dma.hbm_to_vmem [thread:$0]  %s3317_s3, 3072, %s48_s29, [#allocation9], %s2502_s0, %s2502_s0, %s2503_s15  }
  0x36   :  { %s2504_s18 = smov [#allocation11]   ;;  %s2443_s22 = scalar_lea.hbm %s3319_s5, 3072 }
  0x37   :  { %s61_s19 = sshll.u32 %s2504_s18, 4  ;;  %p2444_p10 = scmp.ne.s32.totalorder %s3319_s5, %s2443_s22  ;;  %s62_s19 = int_to_ptr.vmem [resolvable:$true] %s61_s19 }
  0x38   :  { %p2447_p11 = scmp.lt.u32.totalorder %s2443_s22, %s3319_s5 }
  0x3a   :  { %p2449_p12 = pnand %p2447_p11, %p2444_p10 }
  0x3c   :  { %2452 = shalt.err (!%p2449_p12)
}
  0x3d   :  { %s2453_s28 = scalar_lea.vmem %s62_s19, 3072  ;;  %p2458_p0 = scmp.lt.s32.totalorder %s62_s19, %s62_s19 }
  0x3e   :  { %p2454_p13 = scmp.ne.s32.totalorder %s62_s19, %s2453_s28  ;;  %p2459_p1 = scmp.lt.s32.totalorder %s2453_s28, %s2453_s28 }
  0x40   :  { %p2460_p2 = por %p2459_p1, %p2458_p0 }
  0x42   :  { %p2461_p3 = pnand %p2460_p2, %p2454_p13 }
  0x44   :  { %2464 = shalt.err (!%p2461_p3)
}
  0x45   :  { %67 = dma.hbm_to_vmem [thread:$0]  %s3319_s5, 3072, %s62_s19, [#allocation12], %s2502_s0, %s2502_s0, %s2503_s15  }
  0x46   :  { %2487 = dma.done.wait [#allocation6], 1024  }
  0x47   :  { %2488 = vsyncadd [#allocation6], 4294966272 }
  0x48   :  { %2489 = dma.done.wait [#allocation9], 4096  }
  0x49   :  { %2490 = vsyncadd [#allocation9], 4294963200 }
  0x4a   :  { %2491 = dma.done.wait [#allocation12], 3072  }
  0x4b   :  { %2492 = vsyncadd [#allocation12], 4294964224  ;;  %v2201_v0 = vld [vmem:[#allocation8] sm:$0xff]   ;;  %v2202_v1 = vld [vmem:[#allocation8 + $0x8] sm:$0xff]   ;;  %v3322_v45 = vmov 0   ;;  %v3324_v46 = vmov 0.0  }
  0x4c   :  { %1979 = vmatprep.subr.bf16.mxu0 %v2201_v0  ;;  %v2203_v2 = vld [vmem:[#allocation8 + $0x10] sm:$0xff]   ;;  %v2204_v3 = vld [vmem:[#allocation8 + $0x18] sm:$0xff]   ;;  %v83_v4 = vld [vmem:[#allocation5] sm:$0xff]  ;;  %452 = vmatprep.mubr.bf16.mxu1 %v3322_v45  ;;  %vm2507_vm0 = vmmov 0  }
  0x4d   :  { %1980 = vmatpush3.bf16.msra.mxu0 %v2201_v0  ;;  %v84_v5 = vld [vmem:[#allocation5 + $0x8] sm:$0xff]  ;;  %v2209_v7 = vld [vmem:[#allocation10 + $0x4] ss:$12 sps:$4 sm:$0xff]   ;;  %v2217_v13 = vld [vmem:[#allocation10 + $0x34] ss:$12 sps:$4 sm:$0xff]  }
  0x4e   :  { %1981 = vmatprep.subr.bf16.mxu0 %v2202_v1  ;;  %v91_v6 = vpack.c.bf16 %v84_v5, %v83_v4  ;;  %v2211_v8 = vld [vmem:[#allocation10] ss:$12 sps:$4 sm:$0xff]   ;;  %420 = vmatprep.subr.bf16.mxu1 %v2209_v7  ;;  %v2213_v10 = vld [vmem:[#allocation10 + $0x1c] ss:$12 sps:$4 sm:$0xff]   ;;  %v2215_v11 = vld [vmem:[#allocation10 + $0x18] ss:$12 sps:$4 sm:$0xff]  }
  0x4f   :  { %v2205_v9 = vld [vmem:[#allocation8 + $0x20] sm:$0xff]   ;;  %421 = vmatpush1.bf16.msra.mxu1 %v2211_v8  ;;  %v2206_v12 = vld [vmem:[#allocation8 + $0x28] sm:$0xff]   ;;  %v2219_v14 = vld [vmem:[#allocation10 + $0x30] ss:$12 sps:$4 sm:$0xff]  }
  0x50   :  { %1995 = vmatprep.mubr.bf16.mxu0 %v91_v6  ;;  %422 = vmatprep.subr.bf16.mxu1 %v2213_v10  ;;  %v2221_v15 = vld [vmem:[#allocation10 + $0x4c] ss:$12 sps:$4 sm:$0xff]   ;;  %v2207_v16 = vld [vmem:[#allocation8 + $0x30] sm:$0xff]   ;;  %v2229_v23 = vld [vmem:[#allocation10 + $0x7c] ss:$12 sps:$4 sm:$0xff]  }
  0x51   :  { %1982 = vmatpush3.bf16.msra.mxu0 %v2202_v1  ;;  %v2223_v17 = vld [vmem:[#allocation10 + $0x48] ss:$12 sps:$4 sm:$0xff]   ;;  %v2208_v18 = vld [vmem:[#allocation8 + $0x38] sm:$0xff]   ;;  %v2225_v19 = vld [vmem:[#allocation10 + $0x64] ss:$12 sps:$4 sm:$0xff]  }
  0x52   :  { %1983 = vmatprep.subr.bf16.mxu0 %v2203_v2  ;;  %v2227_v20 = vld [vmem:[#allocation10 + $0x60] ss:$12 sps:$4 sm:$0xff]   ;;  %v85_v21 = vld [vmem:[#allocation5 + $0x10] sm:$0xff]  ;;  %v86_v22 = vld [vmem:[#allocation5 + $0x18] sm:$0xff] }
  0x53   :  { %423 = vmatpush1.bf16.msra.mxu1 %v2215_v11  ;;  %v87_v24 = vld [vmem:[#allocation5 + $0x20] sm:$0xff]  ;;  %v88_v25 = vld [vmem:[#allocation5 + $0x28] sm:$0xff]  ;;  %v92_v28 = vpack.c.bf16 %v86_v22, %v85_v21  ;;  %v89_v31 = vld [vmem:[#allocation5 + $0x30] sm:$0xff] }
  0x54   :  { %424 = vmatprep.subr.bf16.mxu1 %v2217_v13  ;;  %v2212_v26 = vld [vmem:[#allocation10 + $0x8] ss:$12 sps:$4 sm:$0xff]   ;;  %v2231_v27 = vld [vmem:[#allocation10 + $0x78] ss:$12 sps:$4 sm:$0xff]   ;;  %v2216_v29 = vld [vmem:[#allocation10 + $0x20] ss:$12 sps:$4 sm:$0xff]   ;;  %v93_v30 = vpack.c.bf16 %v88_v25, %v87_v24 }
  0x55   :  { %1984 = vmatpush3.bf16.msra.mxu0 %v2203_v2  ;;  %v90_v32 = vld [vmem:[#allocation5 + $0x38] sm:$0xff]  ;;  %v2228_v36 = vld [vmem:[#allocation10 + $0x68] ss:$12 sps:$4 sm:$0xff]   ;;  %v2232_v37 = vld [vmem:[#allocation10 + $0x80] ss:$12 sps:$4 sm:$0xff]  }
  0x56   :  { %1985 = vmatprep.subr.bf16.mxu0 %v2204_v3  ;;  %v2220_v33 = vld [vmem:[#allocation10 + $0x38] ss:$12 sps:$4 sm:$0xff]   ;;  %v94_v34 = vpack.c.bf16 %v90_v32, %v89_v31  ;;  %v2224_v35 = vld [vmem:[#allocation10 + $0x50] ss:$12 sps:$4 sm:$0xff]   ;;  %v2233_v38 = vld [vmem:[#allocation10 + $0x94] ss:$12 sps:$4 sm:$0xff]  }
  0x57   :  { %425 = vmatpush1.bf16.msra.mxu1 %v2219_v14  ;;  %v2235_v39 = vld [vmem:[#allocation10 + $0x90] ss:$12 sps:$4 sm:$0xff]   ;;  %v2236_v40 = vld [vmem:[#allocation10 + $0x98] ss:$12 sps:$4 sm:$0xff]   ;;  %v2239_v42 = vld [vmem:[#allocation10 + $0xa8] ss:$12 sps:$4 sm:$0xff]  }
  0x58   :  { %426 = vmatprep.subr.bf16.mxu1 %v2221_v15  ;;  %v2237_v41 = vld [vmem:[#allocation10 + $0xac] ss:$12 sps:$4 sm:$0xff]   ;;  %v2240_v43 = vld [vmem:[#allocation10 + $0xb0] ss:$12 sps:$4 sm:$0xff]   ;;  %v1810_v47 = vld [vmem:[%s3316_s2] ss:$0 sm:$0xff] }
  0x59   :  { %1986 = vmatpush3.bf16.msra.mxu0 %v2204_v3  ;;  %v2600_v44 = vld [vmem:[#allocation11 + $0x4] ss:$12 sps:$4 sm:$0xff]   ;;  %v2608_v61 = vld [vmem:[#allocation11] ss:$12 sps:$4 sm:$0xff]   ;;  %v2610_v0 = vld [vmem:[#allocation11 + $0x1c] ss:$12 sps:$4 sm:$0xff]  }
  0x5a   :  { %1987 = vmatprep.subr.bf16.mxu0 %v2205_v9  ;;  %v2612_v3 = vld [vmem:[#allocation11 + $0x8] ss:$12 sps:$4 sm:$0xff]   ;;  %v2622_v14 = vld [vmem:[#allocation11 + $0x20] ss:$12 sps:$4 sm:$0xff]   ;;  %v2639_v22 = vld [vmem:[#allocation11 + $0x64] ss:$12 sps:$4 sm:$0xff]  }
  0x5b   :  { %427 = vmatpush1.bf16.msra.mxu1 %v2223_v17  ;;  %v2626_v17 = vld [vmem:[#allocation11 + $0x30] ss:$12 sps:$4 sm:$0xff]   ;;  %v2635_v21 = vld [vmem:[#allocation11 + $0x48] ss:$12 sps:$4 sm:$0xff]   ;;  %v2648_v24 = vld [vmem:[#allocation11 + $0x60] ss:$12 sps:$4 sm:$0xff]  }
  0x5c   :  { %428 = vmatprep.subr.bf16.mxu1 %v2225_v19  ;;  %v2629_v19 = vld [vmem:[#allocation11 + $0x4c] ss:$12 sps:$4 sm:$0xff]   ;;  %v2652_v25 = vld [vmem:[#allocation11 + $0x7c] ss:$12 sps:$4 sm:$0xff]  }
  0x5d   :  { %1988 = vmatpush3.bf16.msra.mxu0 %v2205_v9  ;;  %v2615_v9 = vld [vmem:[#allocation11 + $0x18] ss:$12 sps:$4 sm:$0xff]  }
  0x5e   :  { %1989 = vmatprep.subr.bf16.mxu0 %v2206_v12  ;;  %v2673_v31 = vld [vmem:[#allocation11 + $0xac] ss:$12 sps:$4 sm:$0xff]  }
  0x5f   :  { %429 = vmatpush1.bf16.msra.mxu1 %v2227_v20  ;;  %v2632_v20 = vld [vmem:[#allocation11 + $0x38] ss:$12 sps:$4 sm:$0xff]  }
  0x60   :  { %430 = vmatprep.subr.bf16.mxu1 %v2229_v23  ;;  %v2645_v23 = vld [vmem:[#allocation11 + $0x50] ss:$12 sps:$4 sm:$0xff]   ;;  %v2676_v32 = vld [vmem:[#allocation11 + $0x98] ss:$12 sps:$4 sm:$0xff]  }
  0x61   :  { %1990 = vmatpush3.bf16.msra.mxu0 %v2206_v12  ;;  %v2619_v12 = vld [vmem:[#allocation11 + $0x34] ss:$12 sps:$4 sm:$0xff]  }
  0x62   :  { %1991 = vmatprep.subr.bf16.mxu0 %v2207_v16 }
  0x63   :  { %431 = vmatpush1.bf16.msra.mxu1 %v2231_v27  ;;  %v2658_v27 = vld [vmem:[#allocation11 + $0x78] ss:$12 sps:$4 sm:$0xff]  }
  0x64   :  { %432 = vmatprep.subr.bf16.mxu1 %v2233_v38  ;;  %v275_v38 = vld [vmem:[%s3318_s4] sm:$0x7] }
  0x65   :  { %1992 = vmatpush3.bf16.msra.mxu0 %v2207_v16 }
  0x66   :  { %1993 = vmatprep.subr.bf16.mxu0 %v2208_v18 }
  0x67   :  { %433 = vmatpush1.bf16.msra.mxu1 %v2235_v39 }
  0x68   :  { %434 = vmatprep.subr.bf16.mxu1 %v2237_v41 }
  0x69   :  { %1994 = vmatpush3.bf16.msra.mxu0 %v2208_v18 }
  0x6a   :  { %2003 = vmatprep.subr.bf16.mxu0 %v2212_v26 }
  0x6b   :  { %435 = vmatpush1.bf16.msra.mxu1 %v2239_v42 }
  0x6c   :  { %1996 = vmatmul.mubr.bf16.vlgmr.msra.gmra.mrb[0].mxu0 %v92_v28  ;;  %817 = vmatprep.subr.bf16.mxu1 %v2600_v44  ;;  %v2662_v28 = vld [vmem:[#allocation11 + $0x94] ss:$12 sps:$4 sm:$0xff]  }
  0x6d   :  { %1999 = vmatprep.mubr.bf16.mxu0 %v93_v30  ;;  %2004 = vmatpush3.bf16.msra.mxu0 %v2212_v26  ;;  %v2655_v26 = vld [vmem:[#allocation11 + $0x68] ss:$12 sps:$4 sm:$0xff]   ;;  %v2669_v30 = vld [vmem:[#allocation11 + $0x90] ss:$12 sps:$4 sm:$0xff]  }
  0x6e   :  { %2005 = vmatprep.subr.bf16.mxu0 %v2216_v29 }
  0x71   :  { %2006 = vmatpush3.bf16.msra.mxu0 %v2216_v29  ;;  %v2666_v29 = vld [vmem:[#allocation11 + $0x80] ss:$12 sps:$4 sm:$0xff]  }
  0x72   :  { %2007 = vmatprep.subr.bf16.mxu0 %v2220_v33 }
  0x74   :  { %2000 = vmatmul.mubr.bf16.gmra.mrb[4].mxu0 %v94_v34  ;;  %v2685_v34 = vld [vmem:[#allocation11 + $0xb0] ss:$12 sps:$4 sm:$0xff]  }
  0x75   :  { %2008 = vmatpush3.bf16.msra.mxu0 %v2220_v33  ;;  %v2679_v33 = vld [vmem:[#allocation11 + $0xa8] ss:$12 sps:$4 sm:$0xff]  }
  0x76   :  { %2009 = vmatprep.subr.bf16.mxu0 %v2224_v35 }
  0x79   :  { %2010 = vmatpush3.bf16.msra.mxu0 %v2224_v35  ;;  %v277_v35 = vlaneseq }
  0x7a   :  { %2011 = vmatprep.subr.bf16.mxu0 %v2228_v36 }
  0x7d   :  { %2012 = vmatpush3.bf16.msra.mxu0 %v2228_v36  ;;  %v2729_v36 = vshrl.u32 %v277_v35, 7 }
  0x7e   :  { %2013 = vmatprep.subr.bf16.mxu0 %v2232_v37 }
  0x7f   :  { %v279_v39 = vsub.s32 0, %v2729_v36  ;;  %v283_v41 = vsub.s32 1, %v2729_v36 }
  0x81   :  { %2014 = vmatpush3.bf16.msra.mxu0 %v2232_v37  ;;  %v3326_v37 = vsub.s32 2, %v2729_v36 }
  0x82   :  { %2015 = vmatprep.subr.bf16.mxu0 %v2236_v40 }
  0x83   :  { %v288_v42 = vrot.slane %v275_v38, %v3326_v37 }
  0x85   :  { %2016 = vmatpush3.bf16.msra.mxu0 %v2236_v40  ;;  %v2736_v40 = vand.u32 127, %v277_v35 }
  0x86   :  { %2017 = vmatprep.subr.bf16.mxu0 %v2240_v43 }
  0x87   :  { %3336 = vst [vmem:[#allocation18_spill] sm:$0xff] %v2736_v40  ;;  %vm655_vm2 = vcmp.lt.s32.totalorder %v2736_v40, 16 }
  0x89   :  { %2018 = vmatpush3.bf16.msra.mxu0 %v2240_v43 }
  0x8a   :  { %2027 = vmatprep.subr.bf16.mxu0 %v3324_v46 }
 0x13f   :  { %v1997_v48 = vpop.f32.mrb[0].mxu0 }
 0x140   :  { %v209_v49 = vadd.f32 %v1997_v48, %v1810_v47  ;;  %v200_v50 = vpop.f32.mrb[1].mxu0 }
 0x141   :  { %v201_v51 = vadd.f32 %v1810_v47, %v200_v50  ;;  %v1998_v52 = vpop.f32.mrb[2].mxu0  ;;  %v618_v50 = vadd.s32 256, %v2736_v40 }
 0x142   :  { %v212_v53 = vadd.f32 %v1998_v52, %v1810_v47  ;;  %v203_v54 = vpop.f32.mrb[3].mxu0  ;;  %v233_v56 = vmax.f32 %v209_v49, 0.0 }
 0x143   :  { %v204_v55 = vadd.f32 %v1810_v47, %v203_v54  ;;  %v231_v58 = vmax.f32 %v201_v51, 0.0  ;;  %v2752_v51 = vrot.slane %v275_v38, %v283_v41 }
 0x144   :  { %v234_v57 = vmax.f32 %v212_v53, 0.0 }
 0x145   :  { %v232_v59 = vmax.f32 %v204_v55, 0.0 }
 0x146   :  { %v240_v60 = vpack.c.bf16 %v234_v57, %v233_v56 }
 0x147   :  { %v239_v62 = vpack.c.bf16 %v232_v59, %v231_v58  ;;  %v2001_v63 = vpop.f32.mrb[4].mxu0 }
 0x148   :  { %v225_v1 = vadd.f32 %v2001_v63, %v1810_v47  ;;  %v216_v2 = vpop.f32.mrb[5].mxu0  ;;  %v637_v63 = vand.u32 127, %v618_v50 }
 0x149   :  { %v217_v4 = vadd.f32 %v1810_v47, %v216_v2  ;;  %v2002_v5 = vpop.f32.mrb[6].mxu0  ;;  %453 = vmatmul.mubr.bf16.vlgmr.msra.gmra.mrb[0].mxu1 %v239_v62  ;;  %2019 = vmatprep.mubr.bf16.mxu0 %v239_v62 }
 0x14a   :  { %v237_v6 = vmax.f32 %v225_v1, 0.0  ;;  %v228_v7 = vadd.f32 %v2002_v5, %v1810_v47  ;;  %818 = vmatpush1.bf16.msra.mxu1 %v2608_v61  ;;  %v219_v8 = vpop.f32.mrb[7].mxu0  ;;  %2020 = vmatmul.mubr.bf16.vlgmr.msra.gmra.mrb[8].mxu0 %v240_v60  ;;  %vm2767_vm1 = vcmp.lt.s32.totalorder %v637_v63, 16 }
 0x14b   :  { %v235_v10 = vmax.f32 %v217_v4, 0.0  ;;  %v220_v11 = vadd.f32 %v1810_v47, %v219_v8  ;;  %819 = vmatprep.subr.bf16.mxu1 %v2610_v0  ;;  %462 = vmatprep.mubr.bf16.mxu1 %v3322_v45  ;;  %v2745_v47 = vrot.slane %v275_v38, %v279_v39 }
 0x14c   :  { %v238_v13 = vmax.f32 %v228_v7, 0.0  ;;  %2028 = vmatpush3.bf16.msra.mxu0 %v2612_v3  ;;  %v617_v7 = vadd.s32 128, %v2736_v40 }
 0x14d   :  { %v236_v15 = vmax.f32 %v220_v11, 0.0  ;;  %2029 = vmatprep.subr.bf16.mxu0 %v3324_v46 }
 0x14e   :  { %v242_v16 = vpack.c.bf16 %v238_v13, %v237_v6  ;;  %820 = vmatpush1.bf16.msra.mxu1 %v2615_v9 }
 0x14f   :  { %v241_v18 = vpack.c.bf16 %v236_v15, %v235_v10  ;;  %821 = vmatprep.subr.bf16.mxu1 %v2619_v12 }
 0x150   :  { %2030 = vmatpush3.bf16.msra.mxu0 %v2622_v14 }
 0x151   :  { %463 = vmatmul.mubr.bf16.gmra.mrb[4].mxu1 %v240_v60  ;;  %2023 = vmatprep.mubr.bf16.mxu0 %v241_v18 }
 0x152   :  { %822 = vmatpush1.bf16.msra.mxu1 %v2626_v17  ;;  %2024 = vmatmul.mubr.bf16.gmra.mrb[12].mxu0 %v242_v16 }
 0x153   :  { %823 = vmatprep.subr.bf16.mxu1 %v2629_v19  ;;  %472 = vmatprep.mubr.bf16.mxu1 %v3322_v45 }
 0x154   :  { %2031 = vmatprep.subr.bf16.mxu0 %v3324_v46  ;;  %2043 = vmatprep.mubr.msk.bf16.mxu0 %vm2507_vm0, %v3324_v46 }
 0x155   :  { %2032 = vmatpush3.bf16.msra.mxu0 %v2632_v20 }
 0x156   :  { %824 = vmatpush1.bf16.msra.mxu1 %v2635_v21  ;;  %2033 = vmatprep.subr.bf16.mxu0 %v3324_v46 }
 0x157   :  { %825 = vmatprep.subr.bf16.mxu1 %v2639_v22 }
 0x159   :  { %473 = vmatmul.mubr.bf16.gmra.mrb[8].mxu1 %v241_v18  ;;  %2034 = vmatpush3.bf16.msra.mxu0 %v2645_v23 }
 0x15a   :  { %826 = vmatpush1.bf16.msra.mxu1 %v2648_v24  ;;  %482 = vmatprep.mubr.bf16.mxu1 %v3322_v45 }
 0x15b   :  { %827 = vmatprep.subr.bf16.mxu1 %v2652_v25  ;;  %2035 = vmatprep.subr.bf16.mxu0 %v3324_v46 }
 0x15d   :  { %2036 = vmatpush3.bf16.msra.mxu0 %v2655_v26 }
 0x15e   :  { %828 = vmatpush1.bf16.msra.mxu1 %v2658_v27  ;;  %2037 = vmatprep.subr.bf16.mxu0 %v3324_v46 }
 0x15f   :  { %829 = vmatprep.subr.bf16.mxu1 %v2662_v28 }
 0x161   :  { %483 = vmatmul.mubr.bf16.gmra.mrb[12].mxu1 %v242_v16  ;;  %2038 = vmatpush3.bf16.msra.mxu0 %v2666_v29 }
 0x162   :  { %830 = vmatpush1.bf16.msra.mxu1 %v2669_v30  ;;  %849 = vmatprep.mubr.bf16.mxu1 %v3322_v45 }
 0x163   :  { %831 = vmatprep.subr.bf16.mxu1 %v2673_v31  ;;  %2039 = vmatprep.subr.bf16.mxu0 %v3324_v46 }
 0x165   :  { %2040 = vmatpush3.bf16.msra.mxu0 %v2676_v32 }
 0x166   :  { %832 = vmatpush1.bf16.msra.mxu1 %v2679_v33  ;;  %2041 = vmatprep.subr.bf16.mxu0 %v3324_v46 }
 0x167   :  { %938 = vmatprep.subr.bf16.mxu1 %v2600_v44 }
 0x169   :  { %850 = vmatmul.mubr.bf16.vlgmr.msra.gmra.mrb[16].mxu1 %v3322_v45  ;;  %2042 = vmatpush3.bf16.msra.mxu0 %v2685_v34 }
 0x16a   :  { %2047 = vmatprep.subr.bf16.mxu0 %v3324_v46  ;;  %939 = vmatpush1.bf16.msra.mxu1 %v2608_v61 }
 0x16b   :  { %940 = vmatprep.subr.bf16.mxu1 %v2610_v0  ;;  %970 = vmatprep.mubr.bf16.mxu1 %v3322_v45 }
 0x16c   :  { %2044 = vmatmul.mubr.bf16.vlgmr.msra.gmra.mrb[16].mxu0 %v3322_v45 }
 0x16d   :  { %2048 = vmatpush3.bf16.msra.mxu0 %v2612_v3  ;;  %2063 = vmatprep.mubr.msk.bf16.mxu0 %vm2507_vm0, %v3324_v46 }
 0x16e   :  { %2049 = vmatprep.subr.bf16.mxu0 %v3324_v46  ;;  %941 = vmatpush1.bf16.msra.mxu1 %v2615_v9 }
 0x16f   :  { %942 = vmatprep.subr.bf16.mxu1 %v2619_v12 }
 0x171   :  { %2050 = vmatpush3.bf16.msra.mxu0 %v2622_v14 }
 0x172   :  { %2051 = vmatprep.subr.bf16.mxu0 %v3324_v46  ;;  %943 = vmatpush1.bf16.msra.mxu1 %v2626_v17 }
 0x173   :  { %944 = vmatprep.subr.bf16.mxu1 %v2629_v19 }
 0x175   :  { %2052 = vmatpush3.bf16.msra.mxu0 %v2632_v20 }
 0x176   :  { %2053 = vmatprep.subr.bf16.mxu0 %v3324_v46  ;;  %945 = vmatpush1.bf16.msra.mxu1 %v2635_v21 }
 0x177   :  { %946 = vmatprep.subr.bf16.mxu1 %v2639_v22 }
 0x179   :  { %2054 = vmatpush3.bf16.msra.mxu0 %v2645_v23 }
 0x17a   :  { %2055 = vmatprep.subr.bf16.mxu0 %v3324_v46  ;;  %947 = vmatpush1.bf16.msra.mxu1 %v2648_v24 }
 0x17b   :  { %948 = vmatprep.subr.bf16.mxu1 %v2652_v25 }
 0x17d   :  { %2056 = vmatpush3.bf16.msra.mxu0 %v2655_v26 }
 0x17e   :  { %2057 = vmatprep.subr.bf16.mxu0 %v3324_v46  ;;  %949 = vmatpush1.bf16.msra.mxu1 %v2658_v27 }
 0x17f   :  { %950 = vmatprep.subr.bf16.mxu1 %v2662_v28 }
 0x181   :  { %2058 = vmatpush3.bf16.msra.mxu0 %v2666_v29 }
 0x182   :  { %2059 = vmatprep.subr.bf16.mxu0 %v3324_v46  ;;  %951 = vmatpush1.bf16.msra.mxu1 %v2669_v30 }
 0x183   :  { %952 = vmatprep.subr.bf16.mxu1 %v2673_v31 }
 0x185   :  { %2060 = vmatpush3.bf16.msra.mxu0 %v2676_v32 }
 0x186   :  { %2061 = vmatprep.subr.bf16.mxu0 %v3324_v46  ;;  %953 = vmatpush1.bf16.msra.mxu1 %v2679_v33 }
 0x187   :  { %1060 = vmatprep.subr.bf16.mxu1 %v2600_v44 }
 0x189   :  { %2062 = vmatpush3.bf16.msra.mxu0 %v2685_v34 }
 0x18a   :  { %2067 = vmatprep.subr.bf16.mxu0 %v3324_v46 }
 0x21c   :  { %v2741_v43 = vpop.f32.mrb[0].mxu1 }
 0x21d   :  { %v2747_v48 = vpop.f32.mrb[1].mxu1  ;;  %v2021_v49 = vpop.f32.mrb[8].mxu0 }
 0x21e   :  { %v2754_v52 = vadd.f32 %v2021_v49, %v288_v42  ;;  %v458_v53 = vpop.f32.mrb[2].mxu1  ;;  %v527_v54 = vpop.f32.mrb[9].mxu0 }
 0x21f   :  { %v2757_v55 = vadd.f32 %v458_v53, %v2745_v47  ;;  %v460_v56 = vpop.f32.mrb[3].mxu1  ;;  %v2022_v57 = vpop.f32.mrb[10].mxu0  ;;  %v2777_v15 = vadd.f32 %v527_v54, %v288_v42 }
 0x220   :  { %v2760_v58 = vadd.f32 %v460_v56, %v2752_v51  ;;  %v2762_v59 = vadd.f32 %v2022_v57, %v288_v42  ;;  %v530_v60 = vpop.f32.mrb[11].mxu0 }
 0x221   :  { %v2764_v62 = vadd.f32 %v530_v60, %v288_v42 }
 0x222   :  { %3337 = vst [vmem:[#allocation19_spill] sm:$0xff] %v2762_v59 }
 0x224   :  { %v464_v1 = vpop.f32.mrb[4].mxu1 }
 0x225   :  { %v465_v2 = vadd.f32 %v464_v1, %v2745_v47  ;;  %v466_v4 = vpop.f32.mrb[5].mxu1  ;;  %v2025_v5 = vpop.f32.mrb[12].mxu0  ;;  %v630_v1 = vand.u32 127, %v617_v7 }
 0x226   :  { %v2773_v8 = vadd.f32 %v466_v4, %v2752_v51  ;;  %v2775_v10 = vadd.f32 %v2025_v5, %v288_v42  ;;  %v468_v11 = vpop.f32.mrb[6].mxu1  ;;  %v543_v13 = vpop.f32.mrb[13].mxu0 }
 0x227   :  { %v469_v16 = vadd.f32 %v468_v11, %v2745_v47  ;;  %v2780_v18 = vadd.f32 %v543_v13, %v288_v42  ;;  %v470_v35 = vpop.f32.mrb[7].mxu1  ;;  %v2026_v38 = vpop.f32.mrb[14].mxu0  ;;  %vm2823_vm3 = vcmp.lt.s32.totalorder %v630_v1, 16 }
 0x228   :  { %v2791_v53 = vadd.f32 %v470_v35, %v2752_v51  ;;  %v2793_v54 = vadd.f32 %v2026_v38, %v288_v42  ;;  %v546_v56 = vpop.f32.mrb[15].mxu0 }
 0x229   :  { %3340 = vst [vmem:[#allocation20_spill] sm:$0xff] %v2780_v18  ;;  %v2803_v63 = vadd.f32 %v546_v56, %v288_v42 }
 0x22c   :  { %v474_v7 = vpop.f32.mrb[8].mxu1 }
 0x22d   :  { %v475_v13 = vadd.f32 %v474_v7, %v2745_v47  ;;  %v476_v35 = vpop.f32.mrb[9].mxu1 }
 0x22e   :  { %v2828_v56 = vadd.f32 %v476_v35, %v2752_v51  ;;  %v478_v5 = vpop.f32.mrb[10].mxu1 }
 0x22f   :  { %v479_v50 = vadd.f32 %v478_v5, %v2745_v47  ;;  %v480_v60 = vpop.f32.mrb[11].mxu1  ;;  %v2833_v42 = vsel %vm655_vm2, %v469_v16, %v475_v13  ;;  %v2837_v57 = vsel %vm655_vm2, %v475_v13, %v469_v16 }
 0x230   :  { %3343 = vst [vmem:[#allocation21_spill] sm:$0xff] %v2828_v56  ;;  %3344 = vst [vmem:[#allocation22_spill] sm:$0xff] %v2837_v57  ;;  %v2840_v1 = vadd.f32 %v480_v60, %v2752_v51 }
 0x231   :  { %v2852_v35 = vsel %vm655_vm2, %v465_v2, %v479_v50  ;;  %v2856_v16 = vsel %vm655_vm2, %v479_v50, %v465_v2  ;;  %v614_v2 = vld [vmem:[%s3320_s6] sm:$0x7]  ;;  %v455_v50 = vadd.f32 %v2741_v43, %v2745_v47  ;;  %s2508_s6 = smov [#allocation13]  }
 0x232   :  { %3345 = vst [vmem:[#allocation23_spill] sm:$0xff] %v2856_v16  ;;  %s1789_s10 = sshll.u32 %s2508_s6, 4  ;;  %s1790_s10 = int_to_ptr.vmem [resolvable:$true] %s1789_s10 }
 0x233   :  { %s2465_s11 = scalar_lea.vmem %s1790_s10, 1024  ;;  %p2470_p5 = scmp.lt.s32.totalorder %s1790_s10, %s1790_s10 }
 0x234   :  { %v484_v7 = vpop.f32.mrb[12].mxu1  ;;  %p2466_p4 = scmp.ne.s32.totalorder %s1790_s10, %s2465_s11  ;;  %p2471_p6 = scmp.lt.s32.totalorder %s2465_s11, %s2465_s11 }
 0x235   :  { %v485_v5 = vadd.f32 %v484_v7, %v2745_v47  ;;  %v486_v11 = vpop.f32.mrb[13].mxu1  ;;  %v2888_v7 = vadd.f32 %v2747_v48, %v2752_v51  ;;  %v2905_v48 = vrot.slane %v614_v2, %v279_v39 }
 0x236   :  { %v2868_v49 = vadd.f32 %v486_v11, %v2752_v51  ;;  %v488_v45 = vpop.f32.mrb[14].mxu1  ;;  %p2472_p7 = por %p2471_p6, %p2470_p5 }
 0x237   :  { %v489_v60 = vadd.f32 %v488_v45, %v2745_v47  ;;  %v490_v46 = vpop.f32.mrb[15].mxu1  ;;  %v2879_v13 = vsel %vm655_vm2, %v2757_v55, %v485_v5  ;;  %v2884_v11 = vsel %vm655_vm2, %v485_v5, %v2757_v55  ;;  %3347 = vst [vmem:[#allocation25_spill] sm:$0xff] %v2888_v7  ;;  %v2917_v55 = vrot.slane %v614_v2, %v283_v41 }
 0x238   :  { %3346 = vst [vmem:[#allocation24_spill] sm:$0xff] %v2884_v11  ;;  %v2891_v4 = vadd.f32 %v490_v46, %v2752_v51  ;;  %p2473_p8 = pnand %p2472_p7, %p2466_p4 }
 0x239   :  { %v670_v47 = vsel %vm655_vm2, %v455_v50, %v489_v60  ;;  %v2909_v46 = vsel %vm655_vm2, %v489_v60, %v455_v50 }
 0x23a   :  { %3348 = vst [vmem:[#allocation26_spill] sm:$0xff] %v2909_v46  ;;  %v671_v51 = vsel %vm2823_vm3, %v2888_v7, %v2891_v4 }
 0x23c   :  { %v851_v39 = vpop.f32.mrb[16].mxu1 }
 0x23d   :  { %v852_v43 = vadd.f32 %v851_v39, %v2905_v48  ;;  %v853_v45 = vpop.f32.mrb[17].mxu1  ;;  %v3349_v39 = vsub.s32 2, %v2729_v36 }
 0x23e   :  { %v854_v60 = vadd.f32 %v853_v45, %v2917_v55  ;;  %v855_v50 = vpop.f32.mrb[18].mxu1 }
 0x23f   :  { %v898_v37 = vadd.f32 %v852_v43, %v670_v47  ;;  %v856_v46 = vpop.f32.mrb[19].mxu1  ;;  %v892_v11 = vpop.f32.mrb[16].mxu0  ;;  %v2927_v7 = vrot.slane %v614_v2, %v3349_v39 }
 0x240   :  { %v905_v16 = vadd.f32 %v854_v60, %v671_v51  ;;  %v2045_v40 = vpop.f32.mrb[17].mxu0  ;;  %v3351_v46 = vmov 0.0   ;;  %v3352_v51 = vmov 0  }
 0x241   :  { %v1867_v57 = vmul.f32 -1.442695, %v898_v37  ;;  %v895_v41 = vpop.f32.mrb[18].mxu0  ;;  %v893_v43 = vadd.f32 %v892_v11, %v2927_v7  ;;  %v3350_v37 = vsel %vm2767_vm1, %v2777_v15, %v2793_v54 }
 0x242   :  { %v2046_v18 = vpop.f32.mrb[19].mxu0  ;;  %v1868_v59 = vmul.f32 -1.442695, %v905_v16 }
 0x243   :  { %2273 = vpow2.f32 %v1867_v57 }
 0x244   :  { %2275 = vpow2.f32 %v1868_v59 }
 0x24d   :  { %v2274_v56 = vpop.eup %2273 }
 0x24e   :  { %v902_v5 = vadd.f32 1.0, %v2274_v56  ;;  %v2276_v45 = vpop.eup %2275 }
 0x24f   :  { %v909_v50 = vadd.f32 1.0, %v2276_v45 }
 0x250   :  { %2277 = vrcp.f32 %v902_v5 }
 0x251   :  { %2279 = vrcp.f32 %v909_v50 }
 0x25a   :  { %v2278_v47 = vpop.eup %2277 }
 0x25b   :  { %v912_v40 = vmul.f32 %v2278_v47, %v893_v43  ;;  %v2280_v18 = vpop.eup %2279 }
 0x25c   :  { %v915_v57 = vsub.f32 1.0, %v2280_v18  ;;  %v917_v16 = vmul.f32 0.0, %v2280_v18  ;;  %v3353_v18 = vsel %vm2823_vm3, %v2760_v58, %v2868_v49 }
 0x25d   :  { %v913_v59 = vadd.f32 %v912_v40, %v3350_v37 }
 0x25f   :  { %2281 = vtanh.f32 %v913_v59 }
 0x269   :  { %v2282_v56 = vpop.eup %2281 }
 0x26a   :  { %v916_v36 = vmul.f32 %v2282_v56, %v915_v57 }
 0x26c   :  { %v2935_v2 = vadd.f32 %v917_v16, %v916_v36 }
 0x26e   :  { %v937_v11 = vpack.c.bf16 %v2935_v2, %v2935_v2 }
 0x270   :  { %971 = vmatmul.mubr.bf16.vlgmr.msra.gmra.mrb[20].mxu1 %v937_v11  ;;  %2064 = vmatmul.mubr.bf16.vlgmr.msra.gmra.mrb[20].mxu0 %v937_v11 }
 0x271   :  { %1061 = vmatpush1.bf16.msra.mxu1 %v2608_v61  ;;  %2068 = vmatpush3.bf16.msra.mxu0 %v2612_v3 }
 0x272   :  { %1062 = vmatprep.subr.bf16.mxu1 %v2610_v0  ;;  %2069 = vmatprep.subr.bf16.mxu0 %v3351_v46 }
 0x273   :  { %1092 = vmatprep.mubr.bf16.mxu1 %v3352_v51  ;;  %2083 = vmatprep.mubr.msk.bf16.mxu0 %vm2507_vm0, %v3351_v46 }
 0x275   :  { %1063 = vmatpush1.bf16.msra.mxu1 %v2615_v9  ;;  %2070 = vmatpush3.bf16.msra.mxu0 %v2622_v14 }
 0x276   :  { %1064 = vmatprep.subr.bf16.mxu1 %v2619_v12  ;;  %2071 = vmatprep.subr.bf16.mxu0 %v3351_v46 }
 0x279   :  { %1065 = vmatpush1.bf16.msra.mxu1 %v2626_v17  ;;  %2072 = vmatpush3.bf16.msra.mxu0 %v2632_v20 }
 0x27a   :  { %1066 = vmatprep.subr.bf16.mxu1 %v2629_v19  ;;  %2073 = vmatprep.subr.bf16.mxu0 %v3351_v46 }
 0x27d   :  { %1067 = vmatpush1.bf16.msra.mxu1 %v2635_v21  ;;  %2074 = vmatpush3.bf16.msra.mxu0 %v2645_v23 }
 0x27e   :  { %1068 = vmatprep.subr.bf16.mxu1 %v2639_v22  ;;  %2075 = vmatprep.subr.bf16.mxu0 %v3351_v46 }
 0x281   :  { %1069 = vmatpush1.bf16.msra.mxu1 %v2648_v24  ;;  %2076 = vmatpush3.bf16.msra.mxu0 %v2655_v26 }
 0x282   :  { %1070 = vmatprep.subr.bf16.mxu1 %v2652_v25  ;;  %2077 = vmatprep.subr.bf16.mxu0 %v3351_v46 }
 0x285   :  { %1071 = vmatpush1.bf16.msra.mxu1 %v2658_v27  ;;  %2078 = vmatpush3.bf16.msra.mxu0 %v2666_v29 }
 0x286   :  { %1072 = vmatprep.subr.bf16.mxu1 %v2662_v28  ;;  %2079 = vmatprep.subr.bf16.mxu0 %v3351_v46 }
 0x289   :  { %1073 = vmatpush1.bf16.msra.mxu1 %v2669_v30  ;;  %2080 = vmatpush3.bf16.msra.mxu0 %v2676_v32 }
 0x28a   :  { %1074 = vmatprep.subr.bf16.mxu1 %v2673_v31  ;;  %2081 = vmatprep.subr.bf16.mxu0 %v3351_v46 }
 0x28d   :  { %1075 = vmatpush1.bf16.msra.mxu1 %v2679_v33  ;;  %2082 = vmatpush3.bf16.msra.mxu0 %v2685_v34 }
 0x28e   :  { %1182 = vmatprep.subr.bf16.mxu1 %v2600_v44  ;;  %2087 = vmatprep.subr.bf16.mxu0 %v3351_v46 }
 0x343   :  { %v972_v5 = vpop.f32.mrb[20].mxu1  ;;  %v1013_v60 = vpop.f32.mrb[20].mxu0 }
 0x344   :  { %v973_v41 = vadd.f32 %v972_v5, %v2905_v48  ;;  %v974_v39 = vpop.f32.mrb[21].mxu1  ;;  %v2065_v45 = vpop.f32.mrb[21].mxu0 }
 0x345   :  { %v975_v50 = vadd.f32 %v974_v39, %v2917_v55  ;;  %v976_v43 = vpop.f32.mrb[22].mxu1  ;;  %v1016_v47 = vpop.f32.mrb[22].mxu0  ;;  %v1014_v45 = vadd.f32 %v1013_v60, %v2927_v7 }
 0x346   :  { %v1019_v40 = vadd.f32 %v973_v41, %v2879_v13  ;;  %v977_v37 = vpop.f32.mrb[23].mxu1  ;;  %v2066_v59 = vpop.f32.mrb[23].mxu0  ;;  %v3354_v43 = vsel %vm2767_vm1, %v2764_v62, %v2775_v10 }
 0x347   :  { %v1026_v57 = vadd.f32 %v975_v50, %v3353_v18 }
 0x348   :  { %v1869_v56 = vmul.f32 -1.442695, %v1019_v40 }
 0x349   :  { %v1870_v36 = vmul.f32 -1.442695, %v1026_v57 }
 0x34a   :  { %2283 = vpow2.f32 %v1869_v56 }
 0x34b   :  { %2285 = vpow2.f32 %v1870_v36 }
 0x354   :  { %v2284_v16 = vpop.eup %2283 }
 0x355   :  { %v1023_v11 = vadd.f32 1.0, %v2284_v16  ;;  %v2286_v5 = vpop.eup %2285 }
 0x356   :  { %v1030_v39 = vadd.f32 1.0, %v2286_v5 }
 0x357   :  { %2287 = vrcp.f32 %v1023_v11 }
 0x358   :  { %2289 = vrcp.f32 %v1030_v39 }
 0x361   :  { %v2288_v13 = vpop.eup %2287 }
 0x362   :  { %v1033_v41 = vmul.f32 %v2288_v13, %v1014_v45  ;;  %v2290_v47 = vpop.eup %2289 }
 0x363   :  { %v1036_v40 = vsub.f32 1.0, %v2290_v47  ;;  %v1038_v18 = vmul.f32 %v2290_v47, %v2935_v2  ;;  %v3355_v47 = vsel %vm2823_vm3, %v2773_v8, %v2840_v1 }
 0x364   :  { %v1034_v50 = vadd.f32 %v1033_v41, %v3354_v43 }
 0x366   :  { %2291 = vtanh.f32 %v1034_v50 }
 0x370   :  { %v2292_v37 = vpop.eup %2291 }
 0x371   :  { %v1037_v59 = vmul.f32 %v2292_v37, %v1036_v40 }
 0x373   :  { %v2989_v57 = vadd.f32 %v1038_v18, %v1037_v59 }
 0x375   :  { %v1059_v60 = vpack.c.bf16 %v2989_v57, %v2989_v57 }
 0x377   :  { %1093 = vmatmul.mubr.bf16.vlgmr.msra.gmra.mrb[24].mxu1 %v1059_v60  ;;  %2084 = vmatmul.mubr.bf16.vlgmr.msra.gmra.mrb[24].mxu0 %v1059_v60 }
 0x378   :  { %1183 = vmatpush1.bf16.msra.mxu1 %v2608_v61  ;;  %2088 = vmatpush3.bf16.msra.mxu0 %v2612_v3 }
 0x379   :  { %1184 = vmatprep.subr.bf16.mxu1 %v2610_v0  ;;  %2089 = vmatprep.subr.bf16.mxu0 %v3351_v46 }
 0x37a   :  { %1214 = vmatprep.mubr.bf16.mxu1 %v3352_v51  ;;  %2103 = vmatprep.mubr.msk.bf16.mxu0 %vm2507_vm0, %v3351_v46 }
 0x37c   :  { %1185 = vmatpush1.bf16.msra.mxu1 %v2615_v9  ;;  %2090 = vmatpush3.bf16.msra.mxu0 %v2622_v14 }
 0x37d   :  { %1186 = vmatprep.subr.bf16.mxu1 %v2619_v12  ;;  %2091 = vmatprep.subr.bf16.mxu0 %v3351_v46 }
 0x380   :  { %1187 = vmatpush1.bf16.msra.mxu1 %v2626_v17  ;;  %2092 = vmatpush3.bf16.msra.mxu0 %v2632_v20 }
 0x381   :  { %1188 = vmatprep.subr.bf16.mxu1 %v2629_v19  ;;  %2093 = vmatprep.subr.bf16.mxu0 %v3351_v46 }
 0x384   :  { %1189 = vmatpush1.bf16.msra.mxu1 %v2635_v21  ;;  %2094 = vmatpush3.bf16.msra.mxu0 %v2645_v23 }
 0x385   :  { %1190 = vmatprep.subr.bf16.mxu1 %v2639_v22  ;;  %2095 = vmatprep.subr.bf16.mxu0 %v3351_v46 }
 0x388   :  { %1191 = vmatpush1.bf16.msra.mxu1 %v2648_v24  ;;  %2096 = vmatpush3.bf16.msra.mxu0 %v2655_v26 }
 0x389   :  { %1192 = vmatprep.subr.bf16.mxu1 %v2652_v25  ;;  %2097 = vmatprep.subr.bf16.mxu0 %v3351_v46 }
 0x38c   :  { %1193 = vmatpush1.bf16.msra.mxu1 %v2658_v27  ;;  %2098 = vmatpush3.bf16.msra.mxu0 %v2666_v29 }
 0x38d   :  { %1194 = vmatprep.subr.bf16.mxu1 %v2662_v28  ;;  %2099 = vmatprep.subr.bf16.mxu0 %v3351_v46 }
 0x390   :  { %1195 = vmatpush1.bf16.msra.mxu1 %v2669_v30  ;;  %2100 = vmatpush3.bf16.msra.mxu0 %v2676_v32 }
 0x391   :  { %1196 = vmatprep.subr.bf16.mxu1 %v2673_v31  ;;  %2101 = vmatprep.subr.bf16.mxu0 %v3351_v46 }
 0x394   :  { %1197 = vmatpush1.bf16.msra.mxu1 %v2679_v33  ;;  %2102 = vmatpush3.bf16.msra.mxu0 %v2685_v34 }
 0x395   :  { %1298 = vmatprep.subr.bf16.mxu1 %v2600_v44  ;;  %2107 = vmatprep.subr.bf16.mxu0 %v3351_v46 }
 0x44a   :  { %v1094_v56 = vpop.f32.mrb[24].mxu1  ;;  %v1135_v36 = vpop.f32.mrb[24].mxu0 }
 0x44b   :  { %v1095_v16 = vadd.f32 %v1094_v56, %v2905_v48  ;;  %v1096_v11 = vpop.f32.mrb[25].mxu1  ;;  %v2085_v5 = vpop.f32.mrb[25].mxu0 }
 0x44c   :  { %v1097_v39 = vadd.f32 %v1096_v11, %v2917_v55  ;;  %v1098_v45 = vpop.f32.mrb[26].mxu1  ;;  %v1138_v13 = vpop.f32.mrb[26].mxu0  ;;  %v1136_v5 = vadd.f32 %v1135_v36, %v2927_v7 }
 0x44d   :  { %v1141_v41 = vadd.f32 %v1095_v16, %v2852_v35  ;;  %v1099_v43 = vpop.f32.mrb[27].mxu1  ;;  %v2086_v50 = vpop.f32.mrb[27].mxu0  ;;  %v3356_v45 = vsel %vm2767_vm1, %v2754_v52, %v2803_v63 }
 0x44e   :  { %v1148_v40 = vadd.f32 %v1097_v39, %v3355_v47 }
 0x44f   :  { %v1871_v37 = vmul.f32 -1.442695, %v1141_v41 }
 0x450   :  { %v1872_v59 = vmul.f32 -1.442695, %v1148_v40 }
 0x451   :  { %2293 = vpow2.f32 %v1871_v37 }
 0x452   :  { %2295 = vpow2.f32 %v1872_v59 }
 0x45b   :  { %v2294_v18 = vpop.eup %2293 }
 0x45c   :  { %v1145_v60 = vadd.f32 1.0, %v2294_v18  ;;  %v2296_v56 = vpop.eup %2295 }
 0x45d   :  { %v1152_v11 = vadd.f32 1.0, %v2296_v56 }
 0x45e   :  { %2297 = vrcp.f32 %v1145_v60 }
 0x45f   :  { %2299 = vrcp.f32 %v1152_v11 }
 0x468   :  { %v2298_v35 = vpop.eup %2297 }
 0x469   :  { %v1155_v16 = vmul.f32 %v2298_v35, %v1136_v5  ;;  %v2300_v13 = vpop.eup %2299 }
 0x46a   :  { %v1158_v41 = vsub.f32 1.0, %v2300_v13  ;;  %v1160_v47 = vmul.f32 %v2300_v13, %v2989_v57  ;;  %v3357_v13 = vld [vmem:[#allocation21_spill] sm:$0xff] }
 0x46b   :  { %v1156_v39 = vadd.f32 %v1155_v16, %v3356_v45 }
 0x46d   :  { %2301 = vtanh.f32 %v1156_v39 }
 0x477   :  { %v2302_v43 = vpop.eup %2301 }
 0x478   :  { %v1159_v50 = vmul.f32 %v2302_v43, %v1158_v41  ;;  %v3358_v41 = vsel %vm2823_vm3, %v2791_v53, %v3357_v13 }
 0x47a   :  { %v3043_v40 = vadd.f32 %v1160_v47, %v1159_v50 }
 0x47c   :  { %v1181_v36 = vpack.c.bf16 %v3043_v40, %v3043_v40 }
 0x47e   :  { %1215 = vmatmul.mubr.bf16.vlgmr.msra.gmra.mrb[28].mxu1 %v1181_v36  ;;  %2104 = vmatmul.mubr.bf16.vlgmr.msra.gmra.mrb[28].mxu0 %v1181_v36 }
 0x47f   :  { %1299 = vmatpush1.bf16.msra.mxu1 %v2608_v61  ;;  %2108 = vmatpush3.bf16.msra.mxu0 %v2612_v3 }
 0x480   :  { %1300 = vmatprep.subr.bf16.mxu1 %v2610_v0  ;;  %2109 = vmatprep.subr.bf16.mxu0 %v3351_v46 }
 0x481   :  { %1330 = vmatprep.mubr.bf16.mxu1 %v3352_v51  ;;  %2123 = vmatprep.mubr.msk.bf16.mxu0 %vm2507_vm0, %v3351_v46 }
 0x483   :  { %1301 = vmatpush1.bf16.msra.mxu1 %v2615_v9  ;;  %2110 = vmatpush3.bf16.msra.mxu0 %v2622_v14 }
 0x484   :  { %1302 = vmatprep.subr.bf16.mxu1 %v2619_v12  ;;  %2111 = vmatprep.subr.bf16.mxu0 %v3351_v46 }
 0x487   :  { %1303 = vmatpush1.bf16.msra.mxu1 %v2626_v17  ;;  %2112 = vmatpush3.bf16.msra.mxu0 %v2632_v20 }
 0x488   :  { %1304 = vmatprep.subr.bf16.mxu1 %v2629_v19  ;;  %2113 = vmatprep.subr.bf16.mxu0 %v3351_v46 }
 0x48b   :  { %1305 = vmatpush1.bf16.msra.mxu1 %v2635_v21  ;;  %2114 = vmatpush3.bf16.msra.mxu0 %v2645_v23 }
 0x48c   :  { %1306 = vmatprep.subr.bf16.mxu1 %v2639_v22  ;;  %2115 = vmatprep.subr.bf16.mxu0 %v3351_v46 }
 0x48f   :  { %1307 = vmatpush1.bf16.msra.mxu1 %v2648_v24  ;;  %2116 = vmatpush3.bf16.msra.mxu0 %v2655_v26 }
 0x490   :  { %1308 = vmatprep.subr.bf16.mxu1 %v2652_v25  ;;  %2117 = vmatprep.subr.bf16.mxu0 %v3351_v46 }
 0x493   :  { %1309 = vmatpush1.bf16.msra.mxu1 %v2658_v27  ;;  %2118 = vmatpush3.bf16.msra.mxu0 %v2666_v29 }
 0x494   :  { %1310 = vmatprep.subr.bf16.mxu1 %v2662_v28  ;;  %2119 = vmatprep.subr.bf16.mxu0 %v3351_v46 }
 0x497   :  { %1311 = vmatpush1.bf16.msra.mxu1 %v2669_v30  ;;  %2120 = vmatpush3.bf16.msra.mxu0 %v2676_v32 }
 0x498   :  { %1312 = vmatprep.subr.bf16.mxu1 %v2673_v31  ;;  %2121 = vmatprep.subr.bf16.mxu0 %v3351_v46 }
 0x49b   :  { %1313 = vmatpush1.bf16.msra.mxu1 %v2679_v33  ;;  %2122 = vmatpush3.bf16.msra.mxu0 %v2685_v34 }
 0x49c   :  { %1414 = vmatprep.subr.bf16.mxu1 %v2600_v44  ;;  %2127 = vmatprep.subr.bf16.mxu0 %v3351_v46 }
 0x551   :  { %v1216_v37 = vpop.f32.mrb[28].mxu1  ;;  %v1257_v59 = vpop.f32.mrb[28].mxu0 }
 0x552   :  { %v1217_v18 = vadd.f32 %v1216_v37, %v2905_v48  ;;  %v1218_v60 = vpop.f32.mrb[29].mxu1  ;;  %v2105_v56 = vpop.f32.mrb[29].mxu0 }
 0x553   :  { %v1219_v11 = vadd.f32 %v1218_v60, %v2917_v55  ;;  %v1220_v5 = vpop.f32.mrb[30].mxu1  ;;  %v1260_v35 = vpop.f32.mrb[30].mxu0 }
 0x554   :  { %v1263_v16 = vadd.f32 %v1217_v18, %v2833_v42  ;;  %v1221_v45 = vpop.f32.mrb[31].mxu1  ;;  %v2106_v39 = vpop.f32.mrb[31].mxu0  ;;  %v1258_v5 = vadd.f32 %v1257_v59, %v2927_v7  ;;  %v3359_v35 = vld [vmem:[#allocation19_spill] sm:$0xff] }
 0x555   :  { %v1270_v43 = vadd.f32 %v1219_v11, %v3358_v41  ;;  %v3360_v45 = vld [vmem:[#allocation20_spill] sm:$0xff] }
 0x556   :  { %v1873_v50 = vmul.f32 -1.442695, %v1263_v16  ;;  %v3361_v39 = vsel %vm2767_vm1, %v3359_v35, %v3360_v45 }
 0x557   :  { %v1874_v47 = vmul.f32 -1.442695, %v1270_v43 }
 0x558   :  { %2303 = vpow2.f32 %v1873_v50 }
 0x559   :  { %2305 = vpow2.f32 %v1874_v47 }
 0x562   :  { %v2304_v36 = vpop.eup %2303 }
 0x563   :  { %v1267_v37 = vadd.f32 1.0, %v2304_v36  ;;  %v2306_v60 = vpop.eup %2305 }
 0x564   :  { %v1274_v56 = vadd.f32 1.0, %v2306_v60 }
 0x565   :  { %2307 = vrcp.f32 %v1267_v37  ;;  %v3362_v37 = vld [vmem:[#allocation22_spill] sm:$0xff] }
 0x566   :  { %2309 = vrcp.f32 %v1274_v56 }
 0x56f   :  { %v2308_v42 = vpop.eup %2307 }
 0x570   :  { %v1277_v18 = vmul.f32 %v2308_v42, %v1258_v5  ;;  %v2310_v16 = vpop.eup %2309 }
 0x571   :  { %v1280_v41 = vsub.f32 1.0, %v2310_v16  ;;  %v1282_v47 = vmul.f32 %v2310_v16, %v3043_v40 }
 0x572   :  { %v1278_v11 = vadd.f32 %v1277_v18, %v3361_v39 }
 0x574   :  { %2311 = vtanh.f32 %v1278_v11 }
 0x57e   :  { %v2312_v43 = vpop.eup %2311 }
 0x57f   :  { %v1281_v50 = vmul.f32 %v2312_v43, %v1280_v41 }
 0x581   :  { %v3097_v36 = vadd.f32 %v1282_v47, %v1281_v50 }
 0x583   :  { %v1297_v59 = vpack.c.bf16 %v3097_v36, %v3097_v36 }
 0x585   :  { %1331 = vmatmul.mubr.bf16.vlgmr.msra.gmra.mrb[32].mxu1 %v1297_v59  ;;  %2124 = vmatmul.mubr.bf16.vlgmr.msra.gmra.mrb[32].mxu0 %v1297_v59 }
 0x586   :  { %1415 = vmatpush1.bf16.msra.mxu1 %v2608_v61  ;;  %2128 = vmatpush3.bf16.msra.mxu0 %v2612_v3 }
 0x587   :  { %1416 = vmatprep.subr.bf16.mxu1 %v2610_v0  ;;  %2129 = vmatprep.subr.bf16.mxu0 %v3351_v46 }
 0x588   :  { %1446 = vmatprep.mubr.bf16.mxu1 %v3352_v51  ;;  %2143 = vmatprep.mubr.msk.bf16.mxu0 %vm2507_vm0, %v3351_v46 }
 0x58a   :  { %1417 = vmatpush1.bf16.msra.mxu1 %v2615_v9  ;;  %2130 = vmatpush3.bf16.msra.mxu0 %v2622_v14 }
 0x58b   :  { %1418 = vmatprep.subr.bf16.mxu1 %v2619_v12  ;;  %2131 = vmatprep.subr.bf16.mxu0 %v3351_v46 }
 0x58e   :  { %1419 = vmatpush1.bf16.msra.mxu1 %v2626_v17  ;;  %2132 = vmatpush3.bf16.msra.mxu0 %v2632_v20 }
 0x58f   :  { %1420 = vmatprep.subr.bf16.mxu1 %v2629_v19  ;;  %2133 = vmatprep.subr.bf16.mxu0 %v3351_v46 }
 0x592   :  { %1421 = vmatpush1.bf16.msra.mxu1 %v2635_v21  ;;  %2134 = vmatpush3.bf16.msra.mxu0 %v2645_v23 }
 0x593   :  { %1422 = vmatprep.subr.bf16.mxu1 %v2639_v22  ;;  %2135 = vmatprep.subr.bf16.mxu0 %v3351_v46 }
 0x596   :  { %1423 = vmatpush1.bf16.msra.mxu1 %v2648_v24  ;;  %2136 = vmatpush3.bf16.msra.mxu0 %v2655_v26 }
 0x597   :  { %1424 = vmatprep.subr.bf16.mxu1 %v2652_v25  ;;  %2137 = vmatprep.subr.bf16.mxu0 %v3351_v46 }
 0x59a   :  { %1425 = vmatpush1.bf16.msra.mxu1 %v2658_v27  ;;  %2138 = vmatpush3.bf16.msra.mxu0 %v2666_v29 }
 0x59b   :  { %1426 = vmatprep.subr.bf16.mxu1 %v2662_v28  ;;  %2139 = vmatprep.subr.bf16.mxu0 %v3351_v46 }
 0x59e   :  { %1427 = vmatpush1.bf16.msra.mxu1 %v2669_v30  ;;  %2140 = vmatpush3.bf16.msra.mxu0 %v2676_v32 }
 0x59f   :  { %1428 = vmatprep.subr.bf16.mxu1 %v2673_v31  ;;  %2141 = vmatprep.subr.bf16.mxu0 %v3351_v46 }
 0x5a2   :  { %1429 = vmatpush1.bf16.msra.mxu1 %v2679_v33  ;;  %2142 = vmatpush3.bf16.msra.mxu0 %v2685_v34 }
 0x5a3   :  { %1530 = vmatprep.subr.bf16.mxu1 %v2600_v44  ;;  %2147 = vmatprep.subr.bf16.mxu0 %v3351_v46  ;;  %v3363_v44 = vsel %vm2823_vm3, %v3357_v13, %v2791_v53  ;;  %v3364_v53 = vsel %vm2767_vm1, %v3360_v45, %v3359_v35  ;;  %v3163_v45 = vld [vmem:[#allocation11] ss:$12 sps:$4 sm:$0xff]  }
 0x658   :  { %v1332_v61 = vpop.f32.mrb[32].mxu1  ;;  %v1373_v0 = vpop.f32.mrb[32].mxu0 }
 0x659   :  { %v1333_v3 = vadd.f32 %v1332_v61, %v2905_v48  ;;  %v1334_v9 = vpop.f32.mrb[33].mxu1  ;;  %v2125_v12 = vpop.f32.mrb[33].mxu0  ;;  %v1374_v50 = vadd.f32 %v1373_v0, %v2927_v7 }
 0x65a   :  { %v1335_v14 = vadd.f32 %v1334_v9, %v2917_v55  ;;  %v1336_v17 = vpop.f32.mrb[34].mxu1  ;;  %v1376_v19 = vpop.f32.mrb[34].mxu0 }
 0x65b   :  { %v1379_v60 = vadd.f32 %v1333_v3, %v3362_v37  ;;  %v1337_v56 = vpop.f32.mrb[35].mxu1  ;;  %v2126_v5 = vpop.f32.mrb[35].mxu0 }
 0x65c   :  { %v1386_v42 = vadd.f32 %v1335_v14, %v3363_v44  ;;  %v3169_v56 = vld [vmem:[#allocation11 + $0x1c] ss:$12 sps:$4 sm:$0xff]   ;;  %v3179_v5 = vld [vmem:[#allocation11 + $0x20] ss:$12 sps:$4 sm:$0xff]  }
 0x65d   :  { %v1875_v18 = vmul.f32 -1.442695, %v1379_v60  ;;  %v3166_v60 = vld [vmem:[#allocation11 + $0x8] ss:$12 sps:$4 sm:$0xff]  }
 0x65e   :  { %v1876_v39 = vmul.f32 -1.442695, %v1386_v42  ;;  %v3182_v44 = vld [vmem:[#allocation11 + $0x34] ss:$12 sps:$4 sm:$0xff]   ;;  %v3186_v42 = vld [vmem:[#allocation11 + $0x30] ss:$12 sps:$4 sm:$0xff]  }
 0x65f   :  { %2313 = vpow2.f32 %v1875_v18  ;;  %v3190_v18 = vld [vmem:[#allocation11 + $0x4c] ss:$12 sps:$4 sm:$0xff]  }
 0x660   :  { %2315 = vpow2.f32 %v1876_v39 }
 0x669   :  { %v2314_v11 = vpop.eup %2313 }
 0x66a   :  { %v1383_v16 = vadd.f32 1.0, %v2314_v11  ;;  %v2316_v41 = vpop.eup %2315 }
 0x66b   :  { %v1390_v43 = vadd.f32 1.0, %v2316_v41 }
 0x66c   :  { %2317 = vrcp.f32 %v1383_v16 }
 0x66d   :  { %2319 = vrcp.f32 %v1390_v43 }
 0x676   :  { %v2318_v47 = vpop.eup %2317 }
 0x677   :  { %v1393_v59 = vmul.f32 %v2318_v47, %v1374_v50  ;;  %v2320_v61 = vpop.eup %2319 }
 0x678   :  { %v1396_v3 = vsub.f32 1.0, %v2320_v61  ;;  %v1398_v14 = vmul.f32 %v2320_v61, %v3097_v36 }
 0x679   :  { %v1394_v13 = vadd.f32 %v1393_v59, %v3364_v53 }
 0x67b   :  { %2321 = vtanh.f32 %v1394_v13 }
 0x685   :  { %v2322_v9 = vpop.eup %2321 }
 0x686   :  { %v1397_v12 = vmul.f32 %v2322_v9, %v1396_v3 }
 0x688   :  { %v3151_v17 = vadd.f32 %v1398_v14, %v1397_v12 }
 0x68a   :  { %v1413_v0 = vpack.c.bf16 %v3151_v17, %v3151_v17  ;;  %v1771_v37 = vsel %vm655_vm2, %v3097_v36, %v3151_v17  ;;  %v1772_v35 = vsel %vm655_vm2, %v3151_v17, %v3097_v36  ;;  %v3176_v36 = vld [vmem:[#allocation11 + $0x18] ss:$12 sps:$4 sm:$0xff]  }
 0x68b   :  { %1779 = vst [vmem:[#allocation13 + $0x18] sm:$0xff] %v1771_v37  ;;  %1780 = vst [vmem:[#allocation13 + $0x20] sm:$0xff] %v1772_v35  ;;  %v2366_v35 = vld [vmem:[#allocation11 + $0x60] ss:$12 sps:$4 sm:$0xff]  }
 0x68c   :  { %1447 = vmatmul.mubr.bf16.vlgmr.msra.gmra.mrb[36].mxu1 %v1413_v0  ;;  %2144 = vmatmul.mubr.bf16.vlgmr.msra.gmra.mrb[36].mxu0 %v1413_v0 }
 0x68d   :  { %1531 = vmatpush1.bf16.msra.mxu1 %v3163_v45  ;;  %2148 = vmatpush3.bf16.msra.mxu0 %v3166_v60 }
 0x68e   :  { %1532 = vmatprep.subr.bf16.mxu1 %v3169_v56  ;;  %2149 = vmatprep.subr.bf16.mxu0 %v3351_v46 }
 0x68f   :  { %1562 = vmatprep.mubr.bf16.mxu1 %v3352_v51  ;;  %2163 = vmatprep.mubr.msk.bf16.mxu0 %vm2507_vm0, %v3351_v46 }
 0x691   :  { %1533 = vmatpush1.bf16.msra.mxu1 %v3176_v36  ;;  %2150 = vmatpush3.bf16.msra.mxu0 %v3179_v5 }
 0x692   :  { %1534 = vmatprep.subr.bf16.mxu1 %v3182_v44  ;;  %2151 = vmatprep.subr.bf16.mxu0 %v3351_v46 }
 0x695   :  { %1535 = vmatpush1.bf16.msra.mxu1 %v3186_v42  ;;  %2152 = vmatpush3.bf16.msra.mxu0 %v2632_v20  ;;  %v2361_v20 = vld [vmem:[#allocation11 + $0x4] ss:$12 sps:$4 sm:$0xff]  }
 0x696   :  { %1536 = vmatprep.subr.bf16.mxu1 %v3190_v18  ;;  %2153 = vmatprep.subr.bf16.mxu0 %v3351_v46 }
 0x699   :  { %1537 = vmatpush1.bf16.msra.mxu1 %v2635_v21  ;;  %2154 = vmatpush3.bf16.msra.mxu0 %v2645_v23 }
 0x69a   :  { %1538 = vmatprep.subr.bf16.mxu1 %v2639_v22  ;;  %2155 = vmatprep.subr.bf16.mxu0 %v3351_v46 }
 0x69d   :  { %1539 = vmatpush1.bf16.msra.mxu1 %v2648_v24  ;;  %2156 = vmatpush3.bf16.msra.mxu0 %v2655_v26 }
 0x69e   :  { %1540 = vmatprep.subr.bf16.mxu1 %v2652_v25  ;;  %2157 = vmatprep.subr.bf16.mxu0 %v3351_v46 }
 0x6a1   :  { %1541 = vmatpush1.bf16.msra.mxu1 %v2658_v27  ;;  %2158 = vmatpush3.bf16.msra.mxu0 %v2666_v29  ;;  %v3366_v29 = vld [vmem:[#allocation23_spill] sm:$0xff] }
 0x6a2   :  { %1542 = vmatprep.subr.bf16.mxu1 %v2662_v28  ;;  %2159 = vmatprep.subr.bf16.mxu0 %v3351_v46 }
 0x6a5   :  { %1543 = vmatpush1.bf16.msra.mxu1 %v2669_v30  ;;  %2160 = vmatpush3.bf16.msra.mxu0 %v2676_v32 }
 0x6a6   :  { %1544 = vmatprep.subr.bf16.mxu1 %v2673_v31  ;;  %2161 = vmatprep.subr.bf16.mxu0 %v3351_v46 }
 0x6a9   :  { %1545 = vmatpush1.bf16.msra.mxu1 %v2679_v33  ;;  %2162 = vmatpush3.bf16.msra.mxu0 %v2685_v34  ;;  %v3367_v33 = vsel %vm2823_vm3, %v2840_v1, %v2773_v8  ;;  %v3368_v8 = vsel %vm2767_vm1, %v2803_v63, %v2754_v52  ;;  %v2362_v63 = vld [vmem:[#allocation11 + $0x38] ss:$12 sps:$4 sm:$0xff]  }
 0x6aa   :  { %1646 = vmatprep.subr.bf16.mxu1 %v2361_v20  ;;  %2167 = vmatprep.subr.bf16.mxu0 %v3351_v46  ;;  %v2375_v20 = vld [vmem:[#allocation11 + $0xa8] ss:$12 sps:$4 sm:$0xff]  }
 0x75f   :  { %v1448_v21 = vpop.f32.mrb[36].mxu1  ;;  %v1489_v22 = vpop.f32.mrb[36].mxu0 }
 0x760   :  { %v1449_v23 = vadd.f32 %v1448_v21, %v2905_v48  ;;  %v1450_v24 = vpop.f32.mrb[37].mxu1  ;;  %v2145_v25 = vpop.f32.mrb[37].mxu0  ;;  %v1490_v47 = vadd.f32 %v1489_v22, %v2927_v7  ;;  %v2376_v21 = vld [vmem:[#allocation11 + $0xb0] ss:$12 sps:$4 sm:$0xff]  }
 0x761   :  { %v1451_v26 = vadd.f32 %v1450_v24, %v2917_v55  ;;  %v1452_v27 = vpop.f32.mrb[38].mxu1  ;;  %v1492_v28 = vpop.f32.mrb[38].mxu0 }
 0x762   :  { %v1495_v30 = vadd.f32 %v1449_v23, %v3366_v29  ;;  %v1453_v31 = vpop.f32.mrb[39].mxu1  ;;  %v2146_v32 = vpop.f32.mrb[39].mxu0 }
 0x763   :  { %v1502_v34 = vadd.f32 %v1451_v26, %v3367_v33 }
 0x764   :  { %v1877_v39 = vmul.f32 -1.442695, %v1495_v30  ;;  %v3369_v30 = vld [vmem:[#allocation24_spill] sm:$0xff] }
 0x765   :  { %v1878_v11 = vmul.f32 -1.442695, %v1502_v34 }
 0x766   :  { %2323 = vpow2.f32 %v1877_v39 }
 0x767   :  { %2325 = vpow2.f32 %v1878_v11 }
 0x770   :  { %v2324_v16 = vpop.eup %2323 }
 0x771   :  { %v1499_v41 = vadd.f32 1.0, %v2324_v16  ;;  %v2326_v43 = vpop.eup %2325 }
 0x772   :  { %v1506_v50 = vadd.f32 1.0, %v2326_v43 }
 0x773   :  { %2327 = vrcp.f32 %v1499_v41 }
 0x774   :  { %2329 = vrcp.f32 %v1506_v50 }
 0x77d   :  { %v2328_v59 = vpop.eup %2327 }
 0x77e   :  { %v1509_v53 = vmul.f32 %v2328_v59, %v1490_v47  ;;  %v2330_v13 = vpop.eup %2329 }
 0x77f   :  { %v1512_v61 = vsub.f32 1.0, %v2330_v13  ;;  %v1514_v12 = vmul.f32 %v2330_v13, %v3151_v17  ;;  %v2365_v17 = vld [vmem:[#allocation11 + $0x64] ss:$12 sps:$4 sm:$0xff]  }
 0x780   :  { %v1510_v1 = vadd.f32 %v1509_v53, %v3368_v8 }
 0x782   :  { %2331 = vtanh.f32 %v1510_v1 }
 0x78c   :  { %v2332_v3 = vpop.eup %2331 }
 0x78d   :  { %v1513_v9 = vmul.f32 %v2332_v3, %v1512_v61 }
 0x78f   :  { %v3228_v14 = vadd.f32 %v1514_v12, %v1513_v9 }
 0x791   :  { %v1529_v0 = vpack.c.bf16 %v3228_v14, %v3228_v14  ;;  %v1770_v37 = vsel %vm655_vm2, %v3043_v40, %v3228_v14  ;;  %v1773_v52 = vsel %vm655_vm2, %v3228_v14, %v3043_v40  ;;  %v2364_v40 = vld [vmem:[#allocation11 + $0x50] ss:$12 sps:$4 sm:$0xff]  }
 0x792   :  { %1778 = vst [vmem:[#allocation13 + $0x10] sm:$0xff] %v1770_v37  ;;  %1781 = vst [vmem:[#allocation13 + $0x28] sm:$0xff] %v1773_v52 }
 0x793   :  { %1563 = vmatmul.mubr.bf16.vlgmr.msra.gmra.mrb[40].mxu1 %v1529_v0  ;;  %2164 = vmatmul.mubr.bf16.vlgmr.msra.gmra.mrb[40].mxu0 %v1529_v0 }
 0x794   :  { %1647 = vmatpush1.bf16.msra.mxu1 %v3163_v45  ;;  %2168 = vmatpush3.bf16.msra.mxu0 %v3166_v60  ;;  %v2367_v45 = vld [vmem:[#allocation11 + $0x68] ss:$12 sps:$4 sm:$0xff]  }
 0x795   :  { %1648 = vmatprep.subr.bf16.mxu1 %v3169_v56  ;;  %2169 = vmatprep.subr.bf16.mxu0 %v3351_v46  ;;  %v2368_v60 = vld [vmem:[#allocation11 + $0x7c] ss:$12 sps:$4 sm:$0xff]   ;;  %v2369_v56 = vld [vmem:[#allocation11 + $0x78] ss:$12 sps:$4 sm:$0xff]  }
 0x796   :  { %1678 = vmatprep.mubr.bf16.mxu1 %v3352_v51  ;;  %2183 = vmatprep.mubr.msk.bf16.mxu0 %vm2507_vm0, %v3351_v46  ;;  %v2363_v51 = vld [vmem:[#allocation11 + $0x48] ss:$12 sps:$4 sm:$0xff]  }
 0x798   :  { %1649 = vmatpush1.bf16.msra.mxu1 %v3176_v36  ;;  %2170 = vmatpush3.bf16.msra.mxu0 %v3179_v5  ;;  %v2370_v36 = vld [vmem:[#allocation11 + $0x80] ss:$12 sps:$4 sm:$0xff]  }
 0x799   :  { %1650 = vmatprep.subr.bf16.mxu1 %v3182_v44  ;;  %2171 = vmatprep.subr.bf16.mxu0 %v3351_v46  ;;  %v2371_v5 = vld [vmem:[#allocation11 + $0x94] ss:$12 sps:$4 sm:$0xff]   ;;  %v2372_v44 = vld [vmem:[#allocation11 + $0x90] ss:$12 sps:$4 sm:$0xff]  }
 0x79c   :  { %1651 = vmatpush1.bf16.msra.mxu1 %v3186_v42  ;;  %2172 = vmatpush3.bf16.msra.mxu0 %v2362_v63  ;;  %v2373_v42 = vld [vmem:[#allocation11 + $0x98] ss:$12 sps:$4 sm:$0xff]  }
 0x79d   :  { %1652 = vmatprep.subr.bf16.mxu1 %v3190_v18  ;;  %2173 = vmatprep.subr.bf16.mxu0 %v3351_v46  ;;  %v2374_v18 = vld [vmem:[#allocation11 + $0xac] ss:$12 sps:$4 sm:$0xff]  }
 0x7a0   :  { %1653 = vmatpush1.bf16.msra.mxu1 %v2363_v51  ;;  %2174 = vmatpush3.bf16.msra.mxu0 %v2364_v40 }
 0x7a1   :  { %1654 = vmatprep.subr.bf16.mxu1 %v2365_v17  ;;  %2175 = vmatprep.subr.bf16.mxu0 %v3351_v46 }
 0x7a4   :  { %1655 = vmatpush1.bf16.msra.mxu1 %v2366_v35  ;;  %2176 = vmatpush3.bf16.msra.mxu0 %v2367_v45  ;;  %v3372_v35 = vld [vmem:[#allocation26_spill] sm:$0xff] }
 0x7a5   :  { %1656 = vmatprep.subr.bf16.mxu1 %v2368_v60  ;;  %2177 = vmatprep.subr.bf16.mxu0 %v3351_v46 }
 0x7a8   :  { %1657 = vmatpush1.bf16.msra.mxu1 %v2369_v56  ;;  %2178 = vmatpush3.bf16.msra.mxu0 %v2370_v36 }
 0x7a9   :  { %1658 = vmatprep.subr.bf16.mxu1 %v2371_v5  ;;  %2179 = vmatprep.subr.bf16.mxu0 %v3351_v46 }
 0x7ac   :  { %1659 = vmatpush1.bf16.msra.mxu1 %v2372_v44  ;;  %2180 = vmatpush3.bf16.msra.mxu0 %v2373_v42 }
 0x7ad   :  { %1660 = vmatprep.subr.bf16.mxu1 %v2374_v18  ;;  %2181 = vmatprep.subr.bf16.mxu0 %v3351_v46  ;;  %v3370_v46 = vsel %vm2823_vm3, %v2868_v49, %v2760_v58  ;;  %v3371_v58 = vsel %vm2767_vm1, %v2775_v10, %v2764_v62 }
 0x7b0   :  { %1661 = vmatpush1.bf16.msra.mxu1 %v2375_v20  ;;  %2182 = vmatpush3.bf16.msra.mxu0 %v2376_v21 }
 0x866   :  { %v1564_v22 = vpop.f32.mrb[40].mxu1  ;;  %v1605_v23 = vpop.f32.mrb[40].mxu0 }
 0x867   :  { %v1565_v24 = vadd.f32 %v1564_v22, %v2905_v48  ;;  %v1566_v25 = vpop.f32.mrb[41].mxu1  ;;  %v2165_v26 = vpop.f32.mrb[41].mxu0  ;;  %v1606_v47 = vadd.f32 %v1605_v23, %v2927_v7 }
 0x868   :  { %v1567_v27 = vadd.f32 %v1566_v25, %v2917_v55  ;;  %v1568_v28 = vpop.f32.mrb[42].mxu1  ;;  %v1608_v29 = vpop.f32.mrb[42].mxu0 }
 0x869   :  { %v1611_v31 = vadd.f32 %v1565_v24, %v3369_v30  ;;  %v1569_v32 = vpop.f32.mrb[43].mxu1  ;;  %v2166_v33 = vpop.f32.mrb[43].mxu0 }
 0x86a   :  { %v1618_v34 = vadd.f32 %v1567_v27, %v3370_v46 }
 0x86b   :  { %v1879_v39 = vmul.f32 -1.442695, %v1611_v31 }
 0x86c   :  { %v1880_v11 = vmul.f32 -1.442695, %v1618_v34 }
 0x86d   :  { %2333 = vpow2.f32 %v1879_v39 }
 0x86e   :  { %2335 = vpow2.f32 %v1880_v11 }
 0x877   :  { %v2334_v16 = vpop.eup %2333 }
 0x878   :  { %v1615_v41 = vadd.f32 1.0, %v2334_v16  ;;  %v2336_v43 = vpop.eup %2335 }
 0x879   :  { %v1622_v50 = vadd.f32 1.0, %v2336_v43 }
 0x87a   :  { %2337 = vrcp.f32 %v1615_v41 }
 0x87b   :  { %2339 = vrcp.f32 %v1622_v50 }
 0x884   :  { %v2338_v59 = vpop.eup %2337 }
 0x885   :  { %v1625_v53 = vmul.f32 %v2338_v59, %v1606_v47  ;;  %v2340_v8 = vpop.eup %2339 }
 0x886   :  { %v1628_v1 = vsub.f32 1.0, %v2340_v8  ;;  %v1630_v3 = vmul.f32 %v2340_v8, %v3228_v14 }
 0x887   :  { %v1626_v49 = vadd.f32 %v1625_v53, %v3371_v58 }
 0x889   :  { %2341 = vtanh.f32 %v1626_v49 }
 0x893   :  { %v2342_v13 = vpop.eup %2341 }
 0x894   :  { %v1629_v61 = vmul.f32 %v2342_v13, %v1628_v1 }
 0x896   :  { %v1631_v9 = vadd.f32 %v1630_v3, %v1629_v61 }
 0x898   :  { %v1645_v12 = vpack.c.bf16 %v1631_v9, %v1631_v9  ;;  %v1769_v0 = vsel %vm655_vm2, %v2989_v57, %v1631_v9  ;;  %v1774_v37 = vsel %vm655_vm2, %v1631_v9, %v2989_v57  ;;  %v3373_v57 = vld [vmem:[#allocation25_spill] sm:$0xff] }
 0x899   :  { %1777 = vst [vmem:[#allocation13 + $0x8] sm:$0xff] %v1769_v0  ;;  %1782 = vst [vmem:[#allocation13 + $0x30] sm:$0xff] %v1774_v37  ;;  %v3374_v36 = vsel %vm2823_vm3, %v2891_v4, %v3373_v57  ;;  %v3375_v4 = vsel %vm2767_vm1, %v2793_v54, %v2777_v15 }
 0x89a   :  { %1679 = vmatmul.mubr.bf16.vlgmr.msra.gmra.mrb[44].mxu1 %v1645_v12  ;;  %2184 = vmatmul.mubr.bf16.vlgmr.msra.gmra.mrb[44].mxu0 %v1645_v12 }
 0x96d   :  { %v1680_v62 = vpop.f32.mrb[44].mxu1  ;;  %v1721_v10 = vpop.f32.mrb[44].mxu0 }
 0x96e   :  { %v1681_v52 = vadd.f32 %v1680_v62, %v2905_v48  ;;  %v1682_v63 = vpop.f32.mrb[45].mxu1  ;;  %v2185_v14 = vpop.f32.mrb[45].mxu0  ;;  %v1722_v21 = vadd.f32 %v1721_v10, %v2927_v7 }
 0x96f   :  { %v1683_v51 = vadd.f32 %v1682_v63, %v2917_v55  ;;  %v1684_v40 = vpop.f32.mrb[46].mxu1  ;;  %v1724_v17 = vpop.f32.mrb[46].mxu0 }
 0x970   :  { %v1727_v45 = vadd.f32 %v1681_v52, %v3372_v35  ;;  %v1685_v60 = vpop.f32.mrb[47].mxu1  ;;  %v2186_v56 = vpop.f32.mrb[47].mxu0 }
 0x971   :  { %v1734_v5 = vadd.f32 %v1683_v51, %v3374_v36 }
 0x972   :  { %v1881_v44 = vmul.f32 -1.442695, %v1727_v45 }
 0x973   :  { %v1882_v42 = vmul.f32 -1.442695, %v1734_v5 }
 0x974   :  { %2343 = vpow2.f32 %v1881_v44 }
 0x975   :  { %2345 = vpow2.f32 %v1882_v42 }
 0x97e   :  { %v2344_v48 = vpop.eup %2343 }
 0x97f   :  { %v1731_v18 = vadd.f32 1.0, %v2344_v48  ;;  %v2346_v55 = vpop.eup %2345 }
 0x980   :  { %v1738_v20 = vadd.f32 1.0, %v2346_v55 }
 0x981   :  { %2347 = vrcp.f32 %v1731_v18 }
 0x982   :  { %2349 = vrcp.f32 %v1738_v20 }
 0x98b   :  { %v2348_v22 = vpop.eup %2347 }
 0x98c   :  { %v1741_v23 = vmul.f32 %v2348_v22, %v1722_v21  ;;  %v2350_v24 = vpop.eup %2349 }
 0x98d   :  { %v1744_v25 = vsub.f32 1.0, %v2350_v24  ;;  %v1746_v28 = vmul.f32 %v2350_v24, %v1631_v9 }
 0x98e   :  { %v1742_v38 = vadd.f32 %v1741_v23, %v3375_v4 }
 0x990   :  { %2351 = vtanh.f32 %v1742_v38 }
 0x99a   :  { %v2352_v26 = vpop.eup %2351 }
 0x99b   :  { %v1745_v27 = vmul.f32 %v2352_v26, %v1744_v25 }
 0x99d   :  { %v1747_v29 = vadd.f32 %v1746_v28, %v1745_v27 }
 0x99f   :  { %v1768_v7 = vsel %vm655_vm2, %v2935_v2, %v1747_v29  ;;  %v1775_v6 = vsel %vm655_vm2, %v1747_v29, %v2935_v2 }
 0x9a0   :  { %1776 = vst [vmem:[#allocation13] sm:$0xff] %v1768_v7  ;;  %1783 = vst [vmem:[#allocation13 + $0x38] sm:$0xff] %v1775_v6 }
 0x9a1   :  { %2476 = shalt.err (!%p2473_p8)
}
 0x9a2   :  { %s2477_s14 = scalar_lea.hbm %s3321_s7, 1024 }
 0x9a3   :  { %p2478_p9 = scmp.ne.s32.totalorder %s3321_s7, %s2477_s14  ;;  %p2481_p10 = scmp.lt.u32.totalorder %s2477_s14, %s3321_s7 }
 0x9a5   :  { %p2483_p11 = pnand %p2481_p10, %p2478_p9 }
 0x9a7   :  { %2486 = shalt.err (!%p2483_p11)
}
 0x9a8   :  { %1795 = dma.vmem_to_hbm [thread:$0]  %s1790_s10, 1024, %s3321_s7, [#allocation7], %s2499_s1, %s2499_s1, %s2500_s25  }
 0x9a9   :  { %2493 = dma.done.wait [#allocation7], 1024  }
 0x9aa   :  { %2494 = vsyncadd [#allocation7], 4294966272 }
 0x9ab   :  { %1799 = vsyncpa [#allocation6], 1 }
 0x9ac   :  { %1800 = vsyncpa [#allocation9], 1 }
 0x9ad   :  { %1801 = vsyncpa [#allocation12], 1 }
 0x9ae   :  { %1802 = vsyncpa [#allocation7], 1 }

</bundles_post_ra>
